<compile_context>
chip_gen: v7x
topology: tpu7x:2x2x1
jax: 0.10.0
libtpu: 0.0.40
codegen_flags: <defaults>
</compile_context>

<pallas_src>
import functools
import math

import jax
import jax.numpy as jnp
from jax import lax
from jax.experimental import pallas as pl
from jax.experimental.pallas import tpu as pltpu

EMBED_DIM = 32
NUM_HEADS = 4
FF_DIM = 64
HEAD_DIM = EMBED_DIM // NUM_HEADS
LN_EPS = 1e-5

# Rows of the packed bias / LayerNorm parameter slab (one DMA instead of 13 tiny ones).
_SLAB_ROWS, _SLAB_W = 16, 128
(_R_B_QK_S, _R_B_OUT_S, _R_B_Q_C, _R_B_K_C, _R_B_OUT_C,
 _R_B1, _R_B2, _R_G1, _R_BE1, _R_G2, _R_BE2, _R_G3, _R_BE3) = range(13)


def _layernorm(x, gamma, beta):
    mu = jnp.mean(x, axis=-1, keepdims=True)
    xc = x - mu
    var = jnp.mean(xc * xc, axis=-1, keepdims=True)
    return xc * lax.rsqrt(var + LN_EPS) * gamma + beta


def decoder_block_kernel(tgt_ref, mem_ref,
                         w_qk_s_ref, vo_s_ref, w_q_c_ref, w_k_c_ref, vo_c_ref,
                         w1_ref, w2_ref, bias_ref, out_ref, *, bb, s_t, s_m):
    E, F, H, D = EMBED_DIM, FF_DIM, NUM_HEADS, HEAD_DIM
    x = tgt_ref[...]        # (bb*S_t, E) f32
    mem = mem_ref[...]      # (bb*S_m, E) f32

    def brow(r, w):         # static slab slice -> (1, w) f32, broadcasts over rows
        return bias_ref[r:r + 1, :w]

    def attention(q, k, vx, b_out, s_q, s_k):
        """q: (bb*s_q, E) f32 (scale & bias already applied), k: (bb*s_k, E) f32,
        vx: (bb*s_k, H*E) bf16 = kv @ (W_v·W_out) folded projection.

        Per-batch-item, per-head softmax(Q Kᵀ) @ Vo — no cross-batch masking needed."""
        q = q.astype(jnp.bfloat16)
        k = k.astype(jnp.bfloat16)
        outs = []
        for b in range(bb):                          # static loop, bb small
            qs = q[b * s_q:(b + 1) * s_q]
            ks = k[b * s_k:(b + 1) * s_k]
            vs = vx[b * s_k:(b + 1) * s_k]
            acc = None
            for h in range(H):                       # static loop, H = 4
                sl = slice(h * D, (h + 1) * D)
                # (s_q, D) x (s_k, D) contracting last dims -> (s_q, s_k): MXU "NT" form.
                s = lax.dot_general(qs[:, sl], ks[:, sl], (((1,), (1,)), ((), ())),
                                    preferred_element_type=jnp.float32)
                s = s - jnp.max(s, axis=-1, keepdims=True)
                p = jnp.exp(s)
                p = p * pl.reciprocal(jnp.sum(p, axis=-1, keepdims=True), approx=True)
                o = jnp.dot(p.astype(jnp.bfloat16), vs[:, h * E:(h + 1) * E],
                            preferred_element_type=jnp.float32)
                acc = o if acc is None else acc + o
            outs.append(acc)
        ctx = outs[0] if bb == 1 else jnp.concatenate(outs, axis=0)
        return ctx + b_out

    # --- self attention (fused scaled-Q/K projection + folded V·O projection) + norm1 ---
    x_b = x.astype(jnp.bfloat16)
    qk_s = (jnp.dot(x_b, w_qk_s_ref[...], preferred_element_type=jnp.float32)
            + brow(_R_B_QK_S, 2 * E))
    vx_s = jnp.dot(x_b, vo_s_ref[...],
                   preferred_element_type=jnp.float32).astype(jnp.bfloat16)
    sa = attention(qk_s[:, :E], qk_s[:, E:], vx_s, brow(_R_B_OUT_S, E), s_t, s_t)
    t1 = _layernorm(x + sa, brow(_R_G1, E), brow(_R_BE1, E))

    # --- cross attention + norm2 ---
    t1_b = t1.astype(jnp.bfloat16)
    mem_b = mem.astype(jnp.bfloat16)
    q_c = (jnp.dot(t1_b, w_q_c_ref[...], preferred_element_type=jnp.float32)
           + brow(_R_B_Q_C, E))
    k_c = (jnp.dot(mem_b, w_k_c_ref[...], preferred_element_type=jnp.float32)
           + brow(_R_B_K_C, E))
    vx_c = jnp.dot(mem_b, vo_c_ref[...],
                   preferred_element_type=jnp.float32).astype(jnp.bfloat16)
    ca = attention(q_c, k_c, vx_c, brow(_R_B_OUT_C, E), s_t, s_m)
    t2 = _layernorm(t1 + ca, brow(_R_G2, E), brow(_R_BE2, E))

    # --- feed forward + norm3 ---
    hid = jnp.maximum(
        jnp.dot(t2.astype(jnp.bfloat16), w1_ref[...],
                preferred_element_type=jnp.float32) + brow(_R_B1, F), 0.0)
    ff = (jnp.dot(hid.astype(jnp.bfloat16), w2_ref[...],
                  preferred_element_type=jnp.float32) + brow(_R_B2, E))
    t3 = _layernorm(t2 + ff, brow(_R_G3, E), brow(_R_BE3, E))

    out_ref[...] = t3.astype(out_ref.dtype)


def _pack_params(p):
    """Pre-transpose / pre-fold weights (bf16) and pack all small vectors into one f32 slab.

    - Q weight & bias are pre-scaled by 1/sqrt(head_dim).
    - W_v and W_out are folded per head into Vo (E, H*E); b_v folds into the output bias
      (softmax rows sum to 1), so the kernel never materializes V or a separate out-proj."""
    E, H, D = EMBED_DIM, NUM_HEADS, HEAD_DIM
    inv = 1.0 / math.sqrt(D)

    def fold_vo(w_in, w_out):
        w_v = w_in[2 * E:]                              # (E, E)
        heads = [w_v[h * D:(h + 1) * D].T @ w_out[:, h * D:(h + 1) * D].T
                 for h in range(H)]                     # each (E, E)
        return jnp.concatenate(heads, axis=1)           # (E, H*E) = (32, 128), lane-dense

    w_qk_s = jnp.concatenate([(p["w_in_s"][:E] * inv).T,
                              p["w_in_s"][E:2 * E].T], axis=1)   # (E, 2E)
    vo_s = fold_vo(p["w_in_s"], p["w_out_s"])
    w_q_c = (p["w_in_c"][:E] * inv).T
    w_k_c = p["w_in_c"][E:2 * E].T
    vo_c = fold_vo(p["w_in_c"], p["w_out_c"])
    weights = tuple(w.astype(jnp.bfloat16)
                    for w in (w_qk_s, vo_s, w_q_c, w_k_c, vo_c, p["w1"].T, p["w2"].T))

    b_qk_s = jnp.concatenate([p["b_in_s"][:, :E] * inv, p["b_in_s"][:, E:2 * E]], axis=1)
    b_out_s_eff = p["b_out_s"] + p["b_in_s"][:, 2 * E:] @ p["w_out_s"].T
    b_out_c_eff = p["b_out_c"] + p["b_in_c"][:, 2 * E:] @ p["w_out_c"].T

    slab = jnp.zeros((_SLAB_ROWS, _SLAB_W), jnp.float32)
    rows = [
        (_R_B_QK_S, b_qk_s), (_R_B_OUT_S, b_out_s_eff),
        (_R_B_Q_C, p["b_in_c"][:, :E] * inv), (_R_B_K_C, p["b_in_c"][:, E:2 * E]),
        (_R_B_OUT_C, b_out_c_eff),
        (_R_B1, p["b1"]), (_R_B2, p["b2"]),
        (_R_G1, p["g1"]), (_R_BE1, p["be1"]),
        (_R_G2, p["g2"]), (_R_BE2, p["be2"]),
        (_R_G3, p["g3"]), (_R_BE3, p["be3"]),
    ]
    for r, vec in rows:
        vec = vec.reshape(-1)
        slab = slab.at[r, :vec.shape[0]].set(vec)
    return weights, slab


def _default_batch_block(B, S_t, S_m):
    """v5e/v6e: single TC -> one big grid step. v7x: 2 TCs -> split the batch across the
    'parallel' grid axis when blocks keep row counts that are multiples of 8."""
    try:
        kind = jax.devices()[0].device_kind.lower()
    except Exception:  # pragma: no cover - device query should not break the wrapper
        kind = ""
    if "v7" in kind and B % 2 == 0:
        bb = B // 2
        if (bb * S_t) % 8 == 0 and (bb * S_m) % 8 == 0:
            return bb
    return B


@functools.partial(jax.jit, static_argnames=("bb",))
def _decoder_block_jit(tgt, memory, params, bb):
    B, S_t, E = tgt.shape
    _, S_m, _ = memory.shape

    weights, slab = _pack_params(params)
    tgt2 = tgt.reshape(B * S_t, E)       # fold batch into the matmul row (sublane) dimension
    mem2 = memory.reshape(B * S_m, E)

    kernel = functools.partial(decoder_block_kernel, bb=bb, s_t=S_t, s_m=S_m)
    full2d = lambda arr: pl.BlockSpec(arr.shape, lambda i: (0, 0))

    # Explicit scoped-VMEM budget sized from the resident buffers (double-buffered I/O blocks,
    # activations, per-batch-item per-head score tiles, weights, slab) with 2x margin.
    est = 4 * (2 * 2 * bb * S_t * E          # tgt + out blocks, double-buffered
               + 2 * bb * S_m * E            # mem block, double-buffered
               + 12 * bb * S_t * E + 8 * bb * S_m * E   # f32/bf16 intermediates
               + NUM_HEADS * S_t * max(S_t, S_m)) + (512 * 1024)
    vmem_limit = int(min(48 * 1024 * 1024, max(4 * 1024 * 1024, 2 * est)))

    out2 = pl.pallas_call(
        kernel,
        out_shape=jax.ShapeDtypeStruct((B * S_t, E), jnp.float32),
        grid_spec=pltpu.PrefetchScalarGridSpec(
            num_scalar_prefetch=0,
            grid=(B // bb,),
            in_specs=[pl.BlockSpec((bb * S_t, E), lambda i: (i, 0)),
                      pl.BlockSpec((bb * S_m, E), lambda i: (i, 0))]
                     + [full2d(w) for w in weights]
                     + [full2d(slab)],
            out_specs=pl.BlockSpec((bb * S_t, E), lambda i: (i, 0)),
        ),
        compiler_params=pltpu.CompilerParams(
            dimension_semantics=("parallel",),
            vmem_limit_bytes=vmem_limit,
        ),
    )(tgt2, mem2, *weights, slab)
    return out2.reshape(B, S_t, E)


def decoder_block(tgt, memory, params, batch_block=None):
    """tgt: (B, S_t, E), memory: (B, S_m, E) — batch-major layout (see header comment)."""
    B, S_t, _ = tgt.shape
    _, S_m, _ = memory.shape
    bb = batch_block if batch_block is not None else _default_batch_block(B, S_t, S_m)
    assert B % bb == 0, "batch_block must divide batch"
    if bb != B and ((bb * S_t) % 8 != 0 or (bb * S_m) % 8 != 0):
        bb = B   # keep the (8,128) block-shape rule: fall back to one full-batch block
    return _decoder_block_jit(tgt, memory, params, bb=bb)


def make_params(key):
    ks = jax.random.split(key, 8)
    E, F = EMBED_DIM, FF_DIM
    scale = 0.02
    p = {
        "w_in_s": jax.random.normal(ks[0], (3 * E, E), jnp.float32) * scale,
        "b_in_s": jax.random.normal(ks[1], (1, 3 * E), jnp.float32) * scale,
        "w_out_s": jax.random.normal(ks[2], (E, E), jnp.float32) * scale,
        "b_out_s": jax.random.normal(ks[3], (1, E), jnp.float32) * scale,
        "w_in_c": jax.random.normal(ks[4], (3 * E, E), jnp.float32) * scale,
        "b_in_c": jax.random.normal(ks[5], (1, 3 * E), jnp.float32) * scale,
        "w_out_c": jax.random.normal(ks[6], (E, E), jnp.float32) * scale,
        "b_out_c": jax.random.normal(ks[7], (1, E), jnp.float32) * scale,
    }
    ks2 = jax.random.split(jax.random.fold_in(key, 1), 4)
    p.update({
        "w1": jax.random.normal(ks2[0], (F, E), jnp.float32) * scale,
        "b1": jax.random.normal(ks2[1], (1, F), jnp.float32) * scale,
        "w2": jax.random.normal(ks2[2], (E, F), jnp.float32) * scale,
        "b2": jax.random.normal(ks2[3], (1, E), jnp.float32) * scale,
        "g1": jnp.ones((1, E), jnp.float32), "be1": jnp.zeros((1, E), jnp.float32),
        "g2": jnp.ones((1, E), jnp.float32), "be2": jnp.zeros((1, E), jnp.float32),
        "g3": jnp.ones((1, E), jnp.float32), "be3": jnp.zeros((1, E), jnp.float32),
    })
    return p


# ---------- pure-JAX reference (mirrors PyTorch nn.MultiheadAttention semantics, eval mode) ----------
def _ref_mha(q_in, kv_in, w_in, b_in, w_out, b_out):
    E, H, D = EMBED_DIM, NUM_HEADS, HEAD_DIM
    b = b_in[0]
    q = q_in @ w_in[:E].T + b[:E]
    k = kv_in @ w_in[E:2 * E].T + b[E:2 * E]
    v = kv_in @ w_in[2 * E:].T + b[2 * E:]
    q = q.reshape(-1, H, D).transpose(1, 0, 2) / math.sqrt(D)
    k = k.reshape(-1, H, D).transpose(1, 0, 2)
    v = v.reshape(-1, H, D).transpose(1, 0, 2)
    s = jnp.einsum("hqd,hkd->hqk", q, k)
    p = jax.nn.softmax(s, axis=-1)
    o = jnp.einsum("hqk,hkd->hqd", p, v).transpose(1, 0, 2).reshape(-1, E)
    return o @ w_out.T + b_out[0]


def ref_decoder_block(tgt, memory, p):
    def one(x, mem):
        sa = _ref_mha(x, x, p["w_in_s"], p["b_in_s"], p["w_out_s"], p["b_out_s"])
        t1 = _layernorm(x + sa, p["g1"], p["be1"])
        ca = _ref_mha(t1, mem, p["w_in_c"], p["b_in_c"], p["w_out_c"], p["b_out_c"])
        t2 = _layernorm(t1 + ca, p["g2"], p["be2"])
        ff = jnp.maximum(t2 @ p["w1"].T + p["b1"], 0.0) @ p["w2"].T + p["b2"]
        return _layernorm(t2 + ff, p["g3"], p["be3"])
    return jax.vmap(one)(tgt, memory)


if __name__ == "__main__":
    key = jax.random.PRNGKey(0)
    k_t, k_m, k_p = jax.random.split(key, 3)

    B, S_T, S_M = 2, 8, 16
    tgt = jax.random.normal(k_t, (B, S_T, EMBED_DIM), jnp.float32)
    memory = jax.random.normal(k_m, (B, S_M, EMBED_DIM), jnp.float32)
    params = make_params(k_p)

    out = jax.block_until_ready(decoder_block(tgt, memory, params))
    ref = ref_decoder_block(tgt, memory, params)

    assert out.shape == (B, S_T, EMBED_DIM)
    # Tolerance re-baselined for bf16 MXU operands (f32 accumulation).
    err = float(jnp.max(jnp.abs(out - ref)))
    assert err < 2e-2, f"max abs err {err}"
    print("KERNEL_OK")
</pallas_src>

<mosaic_0001>
module attributes {stable_mosaic.version = 11 : i64} {
  func.func @decoder_block_kernel(%arg0: i32, %arg1: memref<16x32xf32, #tpu.memory_space<vmem>>, %arg2: memref<32x32xf32, #tpu.memory_space<vmem>>, %arg3: memref<32x64xbf16, #tpu.memory_space<vmem>>, %arg4: memref<32x128xbf16, #tpu.memory_space<vmem>>, %arg5: memref<32x32xbf16, #tpu.memory_space<vmem>>, %arg6: memref<32x32xbf16, #tpu.memory_space<vmem>>, %arg7: memref<32x128xbf16, #tpu.memory_space<vmem>>, %arg8: memref<32x64xbf16, #tpu.memory_space<vmem>>, %arg9: memref<64x32xbf16, #tpu.memory_space<vmem>>, %arg10: memref<16x128xf32, #tpu.memory_space<vmem>>, %arg11: memref<16x32xf32, #tpu.memory_space<vmem>>) attributes {dimension_semantics = [#tpu.dimension_semantics<parallel>], iteration_bounds = array<i64: 1>, scalar_prefetch = 0 : i64, scratch_operands = 0 : i64, tpu.core_type = #tpu.core_type<tc>, window_params = [{transform_indices = @transform_0, window_bounds = array<i64: 16, 32>}, {transform_indices = @transform_1, window_bounds = array<i64: 32, 32>}, {pipeline_mode = #tpu.pipeline_mode<synchronous>, transform_indices = @transform_2, window_bounds = array<i64: 32, 64>}, {pipeline_mode = #tpu.pipeline_mode<synchronous>, transform_indices = @transform_3, window_bounds = array<i64: 32, 128>}, {pipeline_mode = #tpu.pipeline_mode<synchronous>, transform_indices = @transform_4, window_bounds = array<i64: 32, 32>}, {pipeline_mode = #tpu.pipeline_mode<synchronous>, transform_indices = @transform_5, window_bounds = array<i64: 32, 32>}, {pipeline_mode = #tpu.pipeline_mode<synchronous>, transform_indices = @transform_6, window_bounds = array<i64: 32, 128>}, {pipeline_mode = #tpu.pipeline_mode<synchronous>, transform_indices = @transform_7, window_bounds = array<i64: 32, 64>}, {pipeline_mode = #tpu.pipeline_mode<synchronous>, transform_indices = @transform_8, window_bounds = array<i64: 64, 32>}, {pipeline_mode = #tpu.pipeline_mode<synchronous>, transform_indices = @transform_9, window_bounds = array<i64: 16, 128>}, {transform_indices = @transform_10, window_bounds = array<i64: 16, 32>}]} {
    %c0 = arith.constant 0 : index
    %c0_0 = arith.constant 0 : index
    %0 = vector.load %arg1[%c0, %c0_0] : memref<16x32xf32, #tpu.memory_space<vmem>>, vector<16x32xf32>
    %c0_1 = arith.constant 0 : index
    %c0_2 = arith.constant 0 : index
    %1 = vector.load %arg2[%c0_1, %c0_2] : memref<32x32xf32, #tpu.memory_space<vmem>>, vector<32x32xf32>
    %2 = arith.truncf %0 : vector<16x32xf32> to vector<16x32xbf16>
    %c0_3 = arith.constant 0 : index
    %c0_4 = arith.constant 0 : index
    %3 = vector.load %arg3[%c0_3, %c0_4] : memref<32x64xbf16, #tpu.memory_space<vmem>>, vector<32x64xbf16>
    %cst = arith.constant dense<0.000000e+00> : vector<16x64xf32>
    %4 = tpu.matmul %2, %3, %cst {dimension_numbers = #tpu.dot_dimension_numbers<[1], [0], [0], [1], [0, 0, 1, 1], [], []>} : vector<16x32xbf16>, vector<32x64xbf16>, vector<16x64xf32> -> vector<16x64xf32>
    %c0_5 = arith.constant 0 : index
    %c0_6 = arith.constant 0 : index
    %5 = vector.load %arg10[%c0_5, %c0_6] : memref<16x128xf32, #tpu.memory_space<vmem>>, vector<1x64xf32>
    %6 = vector.broadcast %5 : vector<1x64xf32> to vector<16x64xf32>
    %7 = arith.addf %4, %6 : vector<16x64xf32>
    %c0_7 = arith.constant 0 : index
    %c0_8 = arith.constant 0 : index
    %8 = vector.load %arg4[%c0_7, %c0_8] : memref<32x128xbf16, #tpu.memory_space<vmem>>, vector<32x128xbf16>
    %cst_9 = arith.constant dense<0.000000e+00> : vector<16x128xf32>
    %9 = tpu.matmul %2, %8, %cst_9 {dimension_numbers = #tpu.dot_dimension_numbers<[1], [0], [0], [1], [0, 0, 1, 1], [], []>} : vector<16x32xbf16>, vector<32x128xbf16>, vector<16x128xf32> -> vector<16x128xf32>
    %10 = arith.truncf %9 : vector<16x128xf32> to vector<16x128xbf16>
    %11 = vector.extract_strided_slice %7 {offsets = [0, 0], sizes = [16, 32], strides = [1, 1]} : vector<16x64xf32> to vector<16x32xf32>
    %12 = vector.extract_strided_slice %7 {offsets = [0, 32], sizes = [16, 32], strides = [1, 1]} : vector<16x64xf32> to vector<16x32xf32>
    %c1 = arith.constant 1 : index
    %c0_10 = arith.constant 0 : index
    %13 = vector.load %arg10[%c1, %c0_10] : memref<16x128xf32, #tpu.memory_space<vmem>>, vector<1x32xf32>
    %14 = arith.truncf %11 : vector<16x32xf32> to vector<16x32xbf16>
    %15 = arith.truncf %12 : vector<16x32xf32> to vector<16x32xbf16>
    %16 = vector.extract_strided_slice %14 {offsets = [0, 0], sizes = [8, 32], strides = [1, 1]} : vector<16x32xbf16> to vector<8x32xbf16>
    %17 = vector.extract_strided_slice %15 {offsets = [0, 0], sizes = [8, 32], strides = [1, 1]} : vector<16x32xbf16> to vector<8x32xbf16>
    %18 = vector.extract_strided_slice %10 {offsets = [0, 0], sizes = [8, 128], strides = [1, 1]} : vector<16x128xbf16> to vector<8x128xbf16>
    %19 = vector.extract_strided_slice %16 {offsets = [0, 0], sizes = [8, 8], strides = [1, 1]} : vector<8x32xbf16> to vector<8x8xbf16>
    %20 = vector.extract_strided_slice %17 {offsets = [0, 0], sizes = [8, 8], strides = [1, 1]} : vector<8x32xbf16> to vector<8x8xbf16>
    %cst_11 = arith.constant dense<0.000000e+00> : vector<8x8xf32>
    %21 = tpu.matmul %19, %20, %cst_11 {dimension_numbers = #tpu.dot_dimension_numbers<[1], [1], [0], [0], [0, 0, 1, 0], [], []>} : vector<8x8xbf16>, vector<8x8xbf16>, vector<8x8xf32> -> vector<8x8xf32>
    %cst_12 = arith.constant dense<0xFF800000> : vector<8xf32>
    %22 = vector.multi_reduction <maximumf>, %21, %cst_12 [1] : vector<8x8xf32> to vector<8xf32>
    %23 = vector.shape_cast %22 : vector<8xf32> to vector<8x1xf32>
    %24 = vector.broadcast %23 : vector<8x1xf32> to vector<8x8xf32>
    %25 = arith.subf %21, %24 : vector<8x8xf32>
    %26 = math.exp %25 : vector<8x8xf32>
    %cst_13 = arith.constant dense<0.000000e+00> : vector<8xf32>
    %27 = vector.multi_reduction <add>, %26, %cst_13 [1] : vector<8x8xf32> to vector<8xf32>
    %28 = vector.shape_cast %27 : vector<8xf32> to vector<8x1xf32>
    %29 = tpu.reciprocal %28 {approx = true} : vector<8x1xf32> -> vector<8x1xf32>
    %30 = vector.broadcast %29 : vector<8x1xf32> to vector<8x8xf32>
    %31 = arith.mulf %26, %30 : vector<8x8xf32>
    %32 = arith.truncf %31 : vector<8x8xf32> to vector<8x8xbf16>
    %33 = vector.extract_strided_slice %18 {offsets = [0, 0], sizes = [8, 32], strides = [1, 1]} : vector<8x128xbf16> to vector<8x32xbf16>
    %cst_14 = arith.constant dense<0.000000e+00> : vector<8x32xf32>
    %34 = tpu.matmul %32, %33, %cst_14 {dimension_numbers = #tpu.dot_dimension_numbers<[1], [0], [0], [1], [0, 0, 1, 1], [], []>} : vector<8x8xbf16>, vector<8x32xbf16>, vector<8x32xf32> -> vector<8x32xf32>
    %35 = vector.extract_strided_slice %16 {offsets = [0, 8], sizes = [8, 8], strides = [1, 1]} : vector<8x32xbf16> to vector<8x8xbf16>
    %36 = vector.extract_strided_slice %17 {offsets = [0, 8], sizes = [8, 8], strides = [1, 1]} : vector<8x32xbf16> to vector<8x8xbf16>
    %cst_15 = arith.constant dense<0.000000e+00> : vector<8x8xf32>
    %37 = tpu.matmul %35, %36, %cst_15 {dimension_numbers = #tpu.dot_dimension_numbers<[1], [1], [0], [0], [0, 0, 1, 0], [], []>} : vector<8x8xbf16>, vector<8x8xbf16>, vector<8x8xf32> -> vector<8x8xf32>
    %cst_16 = arith.constant dense<0xFF800000> : vector<8xf32>
    %38 = vector.multi_reduction <maximumf>, %37, %cst_16 [1] : vector<8x8xf32> to vector<8xf32>
    %39 = vector.shape_cast %38 : vector<8xf32> to vector<8x1xf32>
    %40 = vector.broadcast %39 : vector<8x1xf32> to vector<8x8xf32>
    %41 = arith.subf %37, %40 : vector<8x8xf32>
    %42 = math.exp %41 : vector<8x8xf32>
    %cst_17 = arith.constant dense<0.000000e+00> : vector<8xf32>
    %43 = vector.multi_reduction <add>, %42, %cst_17 [1] : vector<8x8xf32> to vector<8xf32>
    %44 = vector.shape_cast %43 : vector<8xf32> to vector<8x1xf32>
    %45 = tpu.reciprocal %44 {approx = true} : vector<8x1xf32> -> vector<8x1xf32>
    %46 = vector.broadcast %45 : vector<8x1xf32> to vector<8x8xf32>
    %47 = arith.mulf %42, %46 : vector<8x8xf32>
    %48 = arith.truncf %47 : vector<8x8xf32> to vector<8x8xbf16>
    %49 = vector.extract_strided_slice %18 {offsets = [0, 32], sizes = [8, 32], strides = [1, 1]} : vector<8x128xbf16> to vector<8x32xbf16>
    %cst_18 = arith.constant dense<0.000000e+00> : vector<8x32xf32>
    %50 = tpu.matmul %48, %49, %cst_18 {dimension_numbers = #tpu.dot_dimension_numbers<[1], [0], [0], [1], [0, 0, 1, 1], [], []>} : vector<8x8xbf16>, vector<8x32xbf16>, vector<8x32xf32> -> vector<8x32xf32>
    %51 = arith.addf %34, %50 : vector<8x32xf32>
    %52 = vector.extract_strided_slice %16 {offsets = [0, 16], sizes = [8, 8], strides = [1, 1]} : vector<8x32xbf16> to vector<8x8xbf16>
    %53 = vector.extract_strided_slice %17 {offsets = [0, 16], sizes = [8, 8], strides = [1, 1]} : vector<8x32xbf16> to vector<8x8xbf16>
    %cst_19 = arith.constant dense<0.000000e+00> : vector<8x8xf32>
    %54 = tpu.matmul %52, %53, %cst_19 {dimension_numbers = #tpu.dot_dimension_numbers<[1], [1], [0], [0], [0, 0, 1, 0], [], []>} : vector<8x8xbf16>, vector<8x8xbf16>, vector<8x8xf32> -> vector<8x8xf32>
    %cst_20 = arith.constant dense<0xFF800000> : vector<8xf32>
    %55 = vector.multi_reduction <maximumf>, %54, %cst_20 [1] : vector<8x8xf32> to vector<8xf32>
    %56 = vector.shape_cast %55 : vector<8xf32> to vector<8x1xf32>
    %57 = vector.broadcast %56 : vector<8x1xf32> to vector<8x8xf32>
    %58 = arith.subf %54, %57 : vector<8x8xf32>
    %59 = math.exp %58 : vector<8x8xf32>
    %cst_21 = arith.constant dense<0.000000e+00> : vector<8xf32>
    %60 = vector.multi_reduction <add>, %59, %cst_21 [1] : vector<8x8xf32> to vector<8xf32>
    %61 = vector.shape_cast %60 : vector<8xf32> to vector<8x1xf32>
    %62 = tpu.reciprocal %61 {approx = true} : vector<8x1xf32> -> vector<8x1xf32>
    %63 = vector.broadcast %62 : vector<8x1xf32> to vector<8x8xf32>
    %64 = arith.mulf %59, %63 : vector<8x8xf32>
    %65 = arith.truncf %64 : vector<8x8xf32> to vector<8x8xbf16>
    %66 = vector.extract_strided_slice %18 {offsets = [0, 64], sizes = [8, 32], strides = [1, 1]} : vector<8x128xbf16> to vector<8x32xbf16>
    %cst_22 = arith.constant dense<0.000000e+00> : vector<8x32xf32>
    %67 = tpu.matmul %65, %66, %cst_22 {dimension_numbers = #tpu.dot_dimension_numbers<[1], [0], [0], [1], [0, 0, 1, 1], [], []>} : vector<8x8xbf16>, vector<8x32xbf16>, vector<8x32xf32> -> vector<8x32xf32>
    %68 = arith.addf %51, %67 : vector<8x32xf32>
    %69 = vector.extract_strided_slice %16 {offsets = [0, 24], sizes = [8, 8], strides = [1, 1]} : vector<8x32xbf16> to vector<8x8xbf16>
    %70 = vector.extract_strided_slice %17 {offsets = [0, 24], sizes = [8, 8], strides = [1, 1]} : vector<8x32xbf16> to vector<8x8xbf16>
    %cst_23 = arith.constant dense<0.000000e+00> : vector<8x8xf32>
    %71 = tpu.matmul %69, %70, %cst_23 {dimension_numbers = #tpu.dot_dimension_numbers<[1], [1], [0], [0], [0, 0, 1, 0], [], []>} : vector<8x8xbf16>, vector<8x8xbf16>, vector<8x8xf32> -> vector<8x8xf32>
    %cst_24 = arith.constant dense<0xFF800000> : vector<8xf32>
    %72 = vector.multi_reduction <maximumf>, %71, %cst_24 [1] : vector<8x8xf32> to vector<8xf32>
    %73 = vector.shape_cast %72 : vector<8xf32> to vector<8x1xf32>
    %74 = vector.broadcast %73 : vector<8x1xf32> to vector<8x8xf32>
    %75 = arith.subf %71, %74 : vector<8x8xf32>
    %76 = math.exp %75 : vector<8x8xf32>
    %cst_25 = arith.constant dense<0.000000e+00> : vector<8xf32>
    %77 = vector.multi_reduction <add>, %76, %cst_25 [1] : vector<8x8xf32> to vector<8xf32>
    %78 = vector.shape_cast %77 : vector<8xf32> to vector<8x1xf32>
    %79 = tpu.reciprocal %78 {approx = true} : vector<8x1xf32> -> vector<8x1xf32>
    %80 = vector.broadcast %79 : vector<8x1xf32> to vector<8x8xf32>
    %81 = arith.mulf %76, %80 : vector<8x8xf32>
    %82 = arith.truncf %81 : vector<8x8xf32> to vector<8x8xbf16>
    %83 = vector.extract_strided_slice %18 {offsets = [0, 96], sizes = [8, 32], strides = [1, 1]} : vector<8x128xbf16> to vector<8x32xbf16>
    %cst_26 = arith.constant dense<0.000000e+00> : vector<8x32xf32>
    %84 = tpu.matmul %82, %83, %cst_26 {dimension_numbers = #tpu.dot_dimension_numbers<[1], [0], [0], [1], [0, 0, 1, 1], [], []>} : vector<8x8xbf16>, vector<8x32xbf16>, vector<8x32xf32> -> vector<8x32xf32>
    %85 = arith.addf %68, %84 : vector<8x32xf32>
    %86 = vector.extract_strided_slice %14 {offsets = [8, 0], sizes = [8, 32], strides = [1, 1]} : vector<16x32xbf16> to vector<8x32xbf16>
    %87 = vector.extract_strided_slice %15 {offsets = [8, 0], sizes = [8, 32], strides = [1, 1]} : vector<16x32xbf16> to vector<8x32xbf16>
    %88 = vector.extract_strided_slice %10 {offsets = [8, 0], sizes = [8, 128], strides = [1, 1]} : vector<16x128xbf16> to vector<8x128xbf16>
    %89 = vector.extract_strided_slice %86 {offsets = [0, 0], sizes = [8, 8], strides = [1, 1]} : vector<8x32xbf16> to vector<8x8xbf16>
    %90 = vector.extract_strided_slice %87 {offsets = [0, 0], sizes = [8, 8], strides = [1, 1]} : vector<8x32xbf16> to vector<8x8xbf16>
    %cst_27 = arith.constant dense<0.000000e+00> : vector<8x8xf32>
    %91 = tpu.matmul %89, %90, %cst_27 {dimension_numbers = #tpu.dot_dimension_numbers<[1], [1], [0], [0], [0, 0, 1, 0], [], []>} : vector<8x8xbf16>, vector<8x8xbf16>, vector<8x8xf32> -> vector<8x8xf32>
    %cst_28 = arith.constant dense<0xFF800000> : vector<8xf32>
    %92 = vector.multi_reduction <maximumf>, %91, %cst_28 [1] : vector<8x8xf32> to vector<8xf32>
    %93 = vector.shape_cast %92 : vector<8xf32> to vector<8x1xf32>
    %94 = vector.broadcast %93 : vector<8x1xf32> to vector<8x8xf32>
    %95 = arith.subf %91, %94 : vector<8x8xf32>
    %96 = math.exp %95 : vector<8x8xf32>
    %cst_29 = arith.constant dense<0.000000e+00> : vector<8xf32>
    %97 = vector.multi_reduction <add>, %96, %cst_29 [1] : vector<8x8xf32> to vector<8xf32>
    %98 = vector.shape_cast %97 : vector<8xf32> to vector<8x1xf32>
    %99 = tpu.reciprocal %98 {approx = true} : vector<8x1xf32> -> vector<8x1xf32>
    %100 = vector.broadcast %99 : vector<8x1xf32> to vector<8x8xf32>
    %101 = arith.mulf %96, %100 : vector<8x8xf32>
    %102 = arith.truncf %101 : vector<8x8xf32> to vector<8x8xbf16>
    %103 = vector.extract_strided_slice %88 {offsets = [0, 0], sizes = [8, 32], strides = [1, 1]} : vector<8x128xbf16> to vector<8x32xbf16>
    %cst_30 = arith.constant dense<0.000000e+00> : vector<8x32xf32>
    %104 = tpu.matmul %102, %103, %cst_30 {dimension_numbers = #tpu.dot_dimension_numbers<[1], [0], [0], [1], [0, 0, 1, 1], [], []>} : vector<8x8xbf16>, vector<8x32xbf16>, vector<8x32xf32> -> vector<8x32xf32>
    %105 = vector.extract_strided_slice %86 {offsets = [0, 8], sizes = [8, 8], strides = [1, 1]} : vector<8x32xbf16> to vector<8x8xbf16>
    %106 = vector.extract_strided_slice %87 {offsets = [0, 8], sizes = [8, 8], strides = [1, 1]} : vector<8x32xbf16> to vector<8x8xbf16>
    %cst_31 = arith.constant dense<0.000000e+00> : vector<8x8xf32>
    %107 = tpu.matmul %105, %106, %cst_31 {dimension_numbers = #tpu.dot_dimension_numbers<[1], [1], [0], [0], [0, 0, 1, 0], [], []>} : vector<8x8xbf16>, vector<8x8xbf16>, vector<8x8xf32> -> vector<8x8xf32>
    %cst_32 = arith.constant dense<0xFF800000> : vector<8xf32>
    %108 = vector.multi_reduction <maximumf>, %107, %cst_32 [1] : vector<8x8xf32> to vector<8xf32>
    %109 = vector.shape_cast %108 : vector<8xf32> to vector<8x1xf32>
    %110 = vector.broadcast %109 : vector<8x1xf32> to vector<8x8xf32>
    %111 = arith.subf %107, %110 : vector<8x8xf32>
    %112 = math.exp %111 : vector<8x8xf32>
    %cst_33 = arith.constant dense<0.000000e+00> : vector<8xf32>
    %113 = vector.multi_reduction <add>, %112, %cst_33 [1] : vector<8x8xf32> to vector<8xf32>
    %114 = vector.shape_cast %113 : vector<8xf32> to vector<8x1xf32>
    %115 = tpu.reciprocal %114 {approx = true} : vector<8x1xf32> -> vector<8x1xf32>
    %116 = vector.broadcast %115 : vector<8x1xf32> to vector<8x8xf32>
    %117 = arith.mulf %112, %116 : vector<8x8xf32>
    %118 = arith.truncf %117 : vector<8x8xf32> to vector<8x8xbf16>
    %119 = vector.extract_strided_slice %88 {offsets = [0, 32], sizes = [8, 32], strides = [1, 1]} : vector<8x128xbf16> to vector<8x32xbf16>
    %cst_34 = arith.constant dense<0.000000e+00> : vector<8x32xf32>
    %120 = tpu.matmul %118, %119, %cst_34 {dimension_numbers = #tpu.dot_dimension_numbers<[1], [0], [0], [1], [0, 0, 1, 1], [], []>} : vector<8x8xbf16>, vector<8x32xbf16>, vector<8x32xf32> -> vector<8x32xf32>
    %121 = arith.addf %104, %120 : vector<8x32xf32>
    %122 = vector.extract_strided_slice %86 {offsets = [0, 16], sizes = [8, 8], strides = [1, 1]} : vector<8x32xbf16> to vector<8x8xbf16>
    %123 = vector.extract_strided_slice %87 {offsets = [0, 16], sizes = [8, 8], strides = [1, 1]} : vector<8x32xbf16> to vector<8x8xbf16>
    %cst_35 = arith.constant dense<0.000000e+00> : vector<8x8xf32>
    %124 = tpu.matmul %122, %123, %cst_35 {dimension_numbers = #tpu.dot_dimension_numbers<[1], [1], [0], [0], [0, 0, 1, 0], [], []>} : vector<8x8xbf16>, vector<8x8xbf16>, vector<8x8xf32> -> vector<8x8xf32>
    %cst_36 = arith.constant dense<0xFF800000> : vector<8xf32>
    %125 = vector.multi_reduction <maximumf>, %124, %cst_36 [1] : vector<8x8xf32> to vector<8xf32>
    %126 = vector.shape_cast %125 : vector<8xf32> to vector<8x1xf32>
    %127 = vector.broadcast %126 : vector<8x1xf32> to vector<8x8xf32>
    %128 = arith.subf %124, %127 : vector<8x8xf32>
    %129 = math.exp %128 : vector<8x8xf32>
    %cst_37 = arith.constant dense<0.000000e+00> : vector<8xf32>
    %130 = vector.multi_reduction <add>, %129, %cst_37 [1] : vector<8x8xf32> to vector<8xf32>
    %131 = vector.shape_cast %130 : vector<8xf32> to vector<8x1xf32>
    %132 = tpu.reciprocal %131 {approx = true} : vector<8x1xf32> -> vector<8x1xf32>
    %133 = vector.broadcast %132 : vector<8x1xf32> to vector<8x8xf32>
    %134 = arith.mulf %129, %133 : vector<8x8xf32>
    %135 = arith.truncf %134 : vector<8x8xf32> to vector<8x8xbf16>
    %136 = vector.extract_strided_slice %88 {offsets = [0, 64], sizes = [8, 32], strides = [1, 1]} : vector<8x128xbf16> to vector<8x32xbf16>
    %cst_38 = arith.constant dense<0.000000e+00> : vector<8x32xf32>
    %137 = tpu.matmul %135, %136, %cst_38 {dimension_numbers = #tpu.dot_dimension_numbers<[1], [0], [0], [1], [0, 0, 1, 1], [], []>} : vector<8x8xbf16>, vector<8x32xbf16>, vector<8x32xf32> -> vector<8x32xf32>
    %138 = arith.addf %121, %137 : vector<8x32xf32>
    %139 = vector.extract_strided_slice %86 {offsets = [0, 24], sizes = [8, 8], strides = [1, 1]} : vector<8x32xbf16> to vector<8x8xbf16>
    %140 = vector.extract_strided_slice %87 {offsets = [0, 24], sizes = [8, 8], strides = [1, 1]} : vector<8x32xbf16> to vector<8x8xbf16>
    %cst_39 = arith.constant dense<0.000000e+00> : vector<8x8xf32>
    %141 = tpu.matmul %139, %140, %cst_39 {dimension_numbers = #tpu.dot_dimension_numbers<[1], [1], [0], [0], [0, 0, 1, 0], [], []>} : vector<8x8xbf16>, vector<8x8xbf16>, vector<8x8xf32> -> vector<8x8xf32>
    %cst_40 = arith.constant dense<0xFF800000> : vector<8xf32>
    %142 = vector.multi_reduction <maximumf>, %141, %cst_40 [1] : vector<8x8xf32> to vector<8xf32>
    %143 = vector.shape_cast %142 : vector<8xf32> to vector<8x1xf32>
    %144 = vector.broadcast %143 : vector<8x1xf32> to vector<8x8xf32>
    %145 = arith.subf %141, %144 : vector<8x8xf32>
    %146 = math.exp %145 : vector<8x8xf32>
    %cst_41 = arith.constant dense<0.000000e+00> : vector<8xf32>
    %147 = vector.multi_reduction <add>, %146, %cst_41 [1] : vector<8x8xf32> to vector<8xf32>
    %148 = vector.shape_cast %147 : vector<8xf32> to vector<8x1xf32>
    %149 = tpu.reciprocal %148 {approx = true} : vector<8x1xf32> -> vector<8x1xf32>
    %150 = vector.broadcast %149 : vector<8x1xf32> to vector<8x8xf32>
    %151 = arith.mulf %146, %150 : vector<8x8xf32>
    %152 = arith.truncf %151 : vector<8x8xf32> to vector<8x8xbf16>
    %153 = vector.extract_strided_slice %88 {offsets = [0, 96], sizes = [8, 32], strides = [1, 1]} : vector<8x128xbf16> to vector<8x32xbf16>
    %cst_42 = arith.constant dense<0.000000e+00> : vector<8x32xf32>
    %154 = tpu.matmul %152, %153, %cst_42 {dimension_numbers = #tpu.dot_dimension_numbers<[1], [0], [0], [1], [0, 0, 1, 1], [], []>} : vector<8x8xbf16>, vector<8x32xbf16>, vector<8x32xf32> -> vector<8x32xf32>
    %155 = arith.addf %138, %154 : vector<8x32xf32>
    %156 = tpu.concatenate %85, %155 in 0 : vector<8x32xf32>, vector<8x32xf32> -> vector<16x32xf32>
    %157 = vector.broadcast %13 : vector<1x32xf32> to vector<16x32xf32>
    %158 = arith.addf %156, %157 : vector<16x32xf32>
    %159 = arith.addf %0, %158 : vector<16x32xf32>
    %c7 = arith.constant 7 : index
    %c0_43 = arith.constant 0 : index
    %160 = vector.load %arg10[%c7, %c0_43] : memref<16x128xf32, #tpu.memory_space<vmem>>, vector<1x32xf32>
    %c8 = arith.constant 8 : index
    %c0_44 = arith.constant 0 : index
    %161 = vector.load %arg10[%c8, %c0_44] : memref<16x128xf32, #tpu.memory_space<vmem>>, vector<1x32xf32>
    %cst_45 = arith.constant dense<0.000000e+00> : vector<16xf32>
    %162 = vector.multi_reduction <add>, %159, %cst_45 [1] : vector<16x32xf32> to vector<16xf32>
    %163 = vector.shape_cast %162 : vector<16xf32> to vector<16x1xf32>
    %cst_46 = arith.constant 3.200000e+01 : f32
    %164 = vector.broadcast %cst_46 : f32 to vector<16x1xf32>
    %165 = arith.divf %163, %164 : vector<16x1xf32>
    %166 = vector.broadcast %165 : vector<16x1xf32> to vector<16x32xf32>
    %167 = arith.subf %159, %166 : vector<16x32xf32>
    %168 = arith.mulf %167, %167 : vector<16x32xf32>
    %cst_47 = arith.constant dense<0.000000e+00> : vector<16xf32>
    %169 = vector.multi_reduction <add>, %168, %cst_47 [1] : vector<16x32xf32> to vector<16xf32>
    %170 = vector.shape_cast %169 : vector<16xf32> to vector<16x1xf32>
    %cst_48 = arith.constant 3.200000e+01 : f32
    %171 = vector.broadcast %cst_48 : f32 to vector<16x1xf32>
    %172 = arith.divf %170, %171 : vector<16x1xf32>
    %cst_49 = arith.constant 9.99999974E-6 : f32
    %173 = vector.broadcast %cst_49 : f32 to vector<16x1xf32>
    %174 = arith.addf %172, %173 : vector<16x1xf32>
    %175 = math.rsqrt %174 : vector<16x1xf32>
    %176 = vector.broadcast %175 : vector<16x1xf32> to vector<16x32xf32>
    %177 = arith.mulf %167, %176 : vector<16x32xf32>
    %178 = vector.broadcast %160 : vector<1x32xf32> to vector<16x32xf32>
    %179 = arith.mulf %177, %178 : vector<16x32xf32>
    %180 = vector.broadcast %161 : vector<1x32xf32> to vector<16x32xf32>
    %181 = arith.addf %179, %180 : vector<16x32xf32>
    %182 = arith.truncf %181 : vector<16x32xf32> to vector<16x32xbf16>
    %183 = arith.truncf %1 : vector<32x32xf32> to vector<32x32xbf16>
    %c0_50 = arith.constant 0 : index
    %c0_51 = arith.constant 0 : index
    %184 = vector.load %arg5[%c0_50, %c0_51] : memref<32x32xbf16, #tpu.memory_space<vmem>>, vector<32x32xbf16>
    %cst_52 = arith.constant dense<0.000000e+00> : vector<16x32xf32>
    %185 = tpu.matmul %182, %184, %cst_52 {dimension_numbers = #tpu.dot_dimension_numbers<[1], [0], [0], [1], [0, 0, 1, 1], [], []>} : vector<16x32xbf16>, vector<32x32xbf16>, vector<16x32xf32> -> vector<16x32xf32>
    %c2 = arith.constant 2 : index
    %c0_53 = arith.constant 0 : index
    %186 = vector.load %arg10[%c2, %c0_53] : memref<16x128xf32, #tpu.memory_space<vmem>>, vector<1x32xf32>
    %187 = vector.broadcast %186 : vector<1x32xf32> to vector<16x32xf32>
    %188 = arith.addf %185, %187 : vector<16x32xf32>
    %c0_54 = arith.constant 0 : index
    %c0_55 = arith.constant 0 : index
    %189 = vector.load %arg6[%c0_54, %c0_55] : memref<32x32xbf16, #tpu.memory_space<vmem>>, vector<32x32xbf16>
    %cst_56 = arith.constant dense<0.000000e+00> : vector<32x32xf32>
    %190 = tpu.matmul %183, %189, %cst_56 {dimension_numbers = #tpu.dot_dimension_numbers<[1], [0], [0], [1], [0, 0, 1, 1], [], []>} : vector<32x32xbf16>, vector<32x32xbf16>, vector<32x32xf32> -> vector<32x32xf32>
    %c3 = arith.constant 3 : index
    %c0_57 = arith.constant 0 : index
    %191 = vector.load %arg10[%c3, %c0_57] : memref<16x128xf32, #tpu.memory_space<vmem>>, vector<1x32xf32>
    %192 = vector.broadcast %191 : vector<1x32xf32> to vector<32x32xf32>
    %193 = arith.addf %190, %192 : vector<32x32xf32>
    %c0_58 = arith.constant 0 : index
    %c0_59 = arith.constant 0 : index
    %194 = vector.load %arg7[%c0_58, %c0_59] : memref<32x128xbf16, #tpu.memory_space<vmem>>, vector<32x128xbf16>
    %cst_60 = arith.constant dense<0.000000e+00> : vector<32x128xf32>
    %195 = tpu.matmul %183, %194, %cst_60 {dimension_numbers = #tpu.dot_dimension_numbers<[1], [0], [0], [1], [0, 0, 1, 1], [], []>} : vector<32x32xbf16>, vector<32x128xbf16>, vector<32x128xf32> -> vector<32x128xf32>
    %196 = arith.truncf %195 : vector<32x128xf32> to vector<32x128xbf16>
    %c4 = arith.constant 4 : index
    %c0_61 = arith.constant 0 : index
    %197 = vector.load %arg10[%c4, %c0_61] : memref<16x128xf32, #tpu.memory_space<vmem>>, vector<1x32xf32>
    %198 = arith.truncf %188 : vector<16x32xf32> to vector<16x32xbf16>
    %199 = arith.truncf %193 : vector<32x32xf32> to vector<32x32xbf16>
    %200 = vector.extract_strided_slice %198 {offsets = [0, 0], sizes = [8, 32], strides = [1, 1]} : vector<16x32xbf16> to vector<8x32xbf16>
    %201 = vector.extract_strided_slice %199 {offsets = [0, 0], sizes = [16, 32], strides = [1, 1]} : vector<32x32xbf16> to vector<16x32xbf16>
    %202 = vector.extract_strided_slice %196 {offsets = [0, 0], sizes = [16, 128], strides = [1, 1]} : vector<32x128xbf16> to vector<16x128xbf16>
    %203 = vector.extract_strided_slice %200 {offsets = [0, 0], sizes = [8, 8], strides = [1, 1]} : vector<8x32xbf16> to vector<8x8xbf16>
    %204 = vector.extract_strided_slice %201 {offsets = [0, 0], sizes = [16, 8], strides = [1, 1]} : vector<16x32xbf16> to vector<16x8xbf16>
    %cst_62 = arith.constant dense<0.000000e+00> : vector<8x16xf32>
    %205 = tpu.matmul %203, %204, %cst_62 {dimension_numbers = #tpu.dot_dimension_numbers<[1], [1], [0], [0], [0, 0, 1, 0], [], []>} : vector<8x8xbf16>, vector<16x8xbf16>, vector<8x16xf32> -> vector<8x16xf32>
    %cst_63 = arith.constant dense<0xFF800000> : vector<8xf32>
    %206 = vector.multi_reduction <maximumf>, %205, %cst_63 [1] : vector<8x16xf32> to vector<8xf32>
    %207 = vector.shape_cast %206 : vector<8xf32> to vector<8x1xf32>
    %208 = vector.broadcast %207 : vector<8x1xf32> to vector<8x16xf32>
    %209 = arith.subf %205, %208 : vector<8x16xf32>
    %210 = math.exp %209 : vector<8x16xf32>
    %cst_64 = arith.constant dense<0.000000e+00> : vector<8xf32>
    %211 = vector.multi_reduction <add>, %210, %cst_64 [1] : vector<8x16xf32> to vector<8xf32>
    %212 = vector.shape_cast %211 : vector<8xf32> to vector<8x1xf32>
    %213 = tpu.reciprocal %212 {approx = true} : vector<8x1xf32> -> vector<8x1xf32>
    %214 = vector.broadcast %213 : vector<8x1xf32> to vector<8x16xf32>
    %215 = arith.mulf %210, %214 : vector<8x16xf32>
    %216 = arith.truncf %215 : vector<8x16xf32> to vector<8x16xbf16>
    %217 = vector.extract_strided_slice %202 {offsets = [0, 0], sizes = [16, 32], strides = [1, 1]} : vector<16x128xbf16> to vector<16x32xbf16>
    %cst_65 = arith.constant dense<0.000000e+00> : vector<8x32xf32>
    %218 = tpu.matmul %216, %217, %cst_65 {dimension_numbers = #tpu.dot_dimension_numbers<[1], [0], [0], [1], [0, 0, 1, 1], [], []>} : vector<8x16xbf16>, vector<16x32xbf16>, vector<8x32xf32> -> vector<8x32xf32>
    %219 = vector.extract_strided_slice %200 {offsets = [0, 8], sizes = [8, 8], strides = [1, 1]} : vector<8x32xbf16> to vector<8x8xbf16>
    %220 = vector.extract_strided_slice %201 {offsets = [0, 8], sizes = [16, 8], strides = [1, 1]} : vector<16x32xbf16> to vector<16x8xbf16>
    %cst_66 = arith.constant dense<0.000000e+00> : vector<8x16xf32>
    %221 = tpu.matmul %219, %220, %cst_66 {dimension_numbers = #tpu.dot_dimension_numbers<[1], [1], [0], [0], [0, 0, 1, 0], [], []>} : vector<8x8xbf16>, vector<16x8xbf16>, vector<8x16xf32> -> vector<8x16xf32>
    %cst_67 = arith.constant dense<0xFF800000> : vector<8xf32>
    %222 = vector.multi_reduction <maximumf>, %221, %cst_67 [1] : vector<8x16xf32> to vector<8xf32>
    %223 = vector.shape_cast %222 : vector<8xf32> to vector<8x1xf32>
    %224 = vector.broadcast %223 : vector<8x1xf32> to vector<8x16xf32>
    %225 = arith.subf %221, %224 : vector<8x16xf32>
    %226 = math.exp %225 : vector<8x16xf32>
    %cst_68 = arith.constant dense<0.000000e+00> : vector<8xf32>
    %227 = vector.multi_reduction <add>, %226, %cst_68 [1] : vector<8x16xf32> to vector<8xf32>
    %228 = vector.shape_cast %227 : vector<8xf32> to vector<8x1xf32>
    %229 = tpu.reciprocal %228 {approx = true} : vector<8x1xf32> -> vector<8x1xf32>
    %230 = vector.broadcast %229 : vector<8x1xf32> to vector<8x16xf32>
    %231 = arith.mulf %226, %230 : vector<8x16xf32>
    %232 = arith.truncf %231 : vector<8x16xf32> to vector<8x16xbf16>
    %233 = vector.extract_strided_slice %202 {offsets = [0, 32], sizes = [16, 32], strides = [1, 1]} : vector<16x128xbf16> to vector<16x32xbf16>
    %cst_69 = arith.constant dense<0.000000e+00> : vector<8x32xf32>
    %234 = tpu.matmul %232, %233, %cst_69 {dimension_numbers = #tpu.dot_dimension_numbers<[1], [0], [0], [1], [0, 0, 1, 1], [], []>} : vector<8x16xbf16>, vector<16x32xbf16>, vector<8x32xf32> -> vector<8x32xf32>
    %235 = arith.addf %218, %234 : vector<8x32xf32>
    %236 = vector.extract_strided_slice %200 {offsets = [0, 16], sizes = [8, 8], strides = [1, 1]} : vector<8x32xbf16> to vector<8x8xbf16>
    %237 = vector.extract_strided_slice %201 {offsets = [0, 16], sizes = [16, 8], strides = [1, 1]} : vector<16x32xbf16> to vector<16x8xbf16>
    %cst_70 = arith.constant dense<0.000000e+00> : vector<8x16xf32>
    %238 = tpu.matmul %236, %237, %cst_70 {dimension_numbers = #tpu.dot_dimension_numbers<[1], [1], [0], [0], [0, 0, 1, 0], [], []>} : vector<8x8xbf16>, vector<16x8xbf16>, vector<8x16xf32> -> vector<8x16xf32>
    %cst_71 = arith.constant dense<0xFF800000> : vector<8xf32>
    %239 = vector.multi_reduction <maximumf>, %238, %cst_71 [1] : vector<8x16xf32> to vector<8xf32>
    %240 = vector.shape_cast %239 : vector<8xf32> to vector<8x1xf32>
    %241 = vector.broadcast %240 : vector<8x1xf32> to vector<8x16xf32>
    %242 = arith.subf %238, %241 : vector<8x16xf32>
    %243 = math.exp %242 : vector<8x16xf32>
    %cst_72 = arith.constant dense<0.000000e+00> : vector<8xf32>
    %244 = vector.multi_reduction <add>, %243, %cst_72 [1] : vector<8x16xf32> to vector<8xf32>
    %245 = vector.shape_cast %244 : vector<8xf32> to vector<8x1xf32>
    %246 = tpu.reciprocal %245 {approx = true} : vector<8x1xf32> -> vector<8x1xf32>
    %247 = vector.broadcast %246 : vector<8x1xf32> to vector<8x16xf32>
    %248 = arith.mulf %243, %247 : vector<8x16xf32>
    %249 = arith.truncf %248 : vector<8x16xf32> to vector<8x16xbf16>
    %250 = vector.extract_strided_slice %202 {offsets = [0, 64], sizes = [16, 32], strides = [1, 1]} : vector<16x128xbf16> to vector<16x32xbf16>
    %cst_73 = arith.constant dense<0.000000e+00> : vector<8x32xf32>
    %251 = tpu.matmul %249, %250, %cst_73 {dimension_numbers = #tpu.dot_dimension_numbers<[1], [0], [0], [1], [0, 0, 1, 1], [], []>} : vector<8x16xbf16>, vector<16x32xbf16>, vector<8x32xf32> -> vector<8x32xf32>
    %252 = arith.addf %235, %251 : vector<8x32xf32>
    %253 = vector.extract_strided_slice %200 {offsets = [0, 24], sizes = [8, 8], strides = [1, 1]} : vector<8x32xbf16> to vector<8x8xbf16>
    %254 = vector.extract_strided_slice %201 {offsets = [0, 24], sizes = [16, 8], strides = [1, 1]} : vector<16x32xbf16> to vector<16x8xbf16>
    %cst_74 = arith.constant dense<0.000000e+00> : vector<8x16xf32>
    %255 = tpu.matmul %253, %254, %cst_74 {dimension_numbers = #tpu.dot_dimension_numbers<[1], [1], [0], [0], [0, 0, 1, 0], [], []>} : vector<8x8xbf16>, vector<16x8xbf16>, vector<8x16xf32> -> vector<8x16xf32>
    %cst_75 = arith.constant dense<0xFF800000> : vector<8xf32>
    %256 = vector.multi_reduction <maximumf>, %255, %cst_75 [1] : vector<8x16xf32> to vector<8xf32>
    %257 = vector.shape_cast %256 : vector<8xf32> to vector<8x1xf32>
    %258 = vector.broadcast %257 : vector<8x1xf32> to vector<8x16xf32>
    %259 = arith.subf %255, %258 : vector<8x16xf32>
    %260 = math.exp %259 : vector<8x16xf32>
    %cst_76 = arith.constant dense<0.000000e+00> : vector<8xf32>
    %261 = vector.multi_reduction <add>, %260, %cst_76 [1] : vector<8x16xf32> to vector<8xf32>
    %262 = vector.shape_cast %261 : vector<8xf32> to vector<8x1xf32>
    %263 = tpu.reciprocal %262 {approx = true} : vector<8x1xf32> -> vector<8x1xf32>
    %264 = vector.broadcast %263 : vector<8x1xf32> to vector<8x16xf32>
    %265 = arith.mulf %260, %264 : vector<8x16xf32>
    %266 = arith.truncf %265 : vector<8x16xf32> to vector<8x16xbf16>
    %267 = vector.extract_strided_slice %202 {offsets = [0, 96], sizes = [16, 32], strides = [1, 1]} : vector<16x128xbf16> to vector<16x32xbf16>
    %cst_77 = arith.constant dense<0.000000e+00> : vector<8x32xf32>
    %268 = tpu.matmul %266, %267, %cst_77 {dimension_numbers = #tpu.dot_dimension_numbers<[1], [0], [0], [1], [0, 0, 1, 1], [], []>} : vector<8x16xbf16>, vector<16x32xbf16>, vector<8x32xf32> -> vector<8x32xf32>
    %269 = arith.addf %252, %268 : vector<8x32xf32>
    %270 = vector.extract_strided_slice %198 {offsets = [8, 0], sizes = [8, 32], strides = [1, 1]} : vector<16x32xbf16> to vector<8x32xbf16>
    %271 = vector.extract_strided_slice %199 {offsets = [16, 0], sizes = [16, 32], strides = [1, 1]} : vector<32x32xbf16> to vector<16x32xbf16>
    %272 = vector.extract_strided_slice %196 {offsets = [16, 0], sizes = [16, 128], strides = [1, 1]} : vector<32x128xbf16> to vector<16x128xbf16>
    %273 = vector.extract_strided_slice %270 {offsets = [0, 0], sizes = [8, 8], strides = [1, 1]} : vector<8x32xbf16> to vector<8x8xbf16>
    %274 = vector.extract_strided_slice %271 {offsets = [0, 0], sizes = [16, 8], strides = [1, 1]} : vector<16x32xbf16> to vector<16x8xbf16>
    %cst_78 = arith.constant dense<0.000000e+00> : vector<8x16xf32>
    %275 = tpu.matmul %273, %274, %cst_78 {dimension_numbers = #tpu.dot_dimension_numbers<[1], [1], [0], [0], [0, 0, 1, 0], [], []>} : vector<8x8xbf16>, vector<16x8xbf16>, vector<8x16xf32> -> vector<8x16xf32>
    %cst_79 = arith.constant dense<0xFF800000> : vector<8xf32>
    %276 = vector.multi_reduction <maximumf>, %275, %cst_79 [1] : vector<8x16xf32> to vector<8xf32>
    %277 = vector.shape_cast %276 : vector<8xf32> to vector<8x1xf32>
    %278 = vector.broadcast %277 : vector<8x1xf32> to vector<8x16xf32>
    %279 = arith.subf %275, %278 : vector<8x16xf32>
    %280 = math.exp %279 : vector<8x16xf32>
    %cst_80 = arith.constant dense<0.000000e+00> : vector<8xf32>
    %281 = vector.multi_reduction <add>, %280, %cst_80 [1] : vector<8x16xf32> to vector<8xf32>
    %282 = vector.shape_cast %281 : vector<8xf32> to vector<8x1xf32>
    %283 = tpu.reciprocal %282 {approx = true} : vector<8x1xf32> -> vector<8x1xf32>
    %284 = vector.broadcast %283 : vector<8x1xf32> to vector<8x16xf32>
    %285 = arith.mulf %280, %284 : vector<8x16xf32>
    %286 = arith.truncf %285 : vector<8x16xf32> to vector<8x16xbf16>
    %287 = vector.extract_strided_slice %272 {offsets = [0, 0], sizes = [16, 32], strides = [1, 1]} : vector<16x128xbf16> to vector<16x32xbf16>
    %cst_81 = arith.constant dense<0.000000e+00> : vector<8x32xf32>
    %288 = tpu.matmul %286, %287, %cst_81 {dimension_numbers = #tpu.dot_dimension_numbers<[1], [0], [0], [1], [0, 0, 1, 1], [], []>} : vector<8x16xbf16>, vector<16x32xbf16>, vector<8x32xf32> -> vector<8x32xf32>
    %289 = vector.extract_strided_slice %270 {offsets = [0, 8], sizes = [8, 8], strides = [1, 1]} : vector<8x32xbf16> to vector<8x8xbf16>
    %290 = vector.extract_strided_slice %271 {offsets = [0, 8], sizes = [16, 8], strides = [1, 1]} : vector<16x32xbf16> to vector<16x8xbf16>
    %cst_82 = arith.constant dense<0.000000e+00> : vector<8x16xf32>
    %291 = tpu.matmul %289, %290, %cst_82 {dimension_numbers = #tpu.dot_dimension_numbers<[1], [1], [0], [0], [0, 0, 1, 0], [], []>} : vector<8x8xbf16>, vector<16x8xbf16>, vector<8x16xf32> -> vector<8x16xf32>
    %cst_83 = arith.constant dense<0xFF800000> : vector<8xf32>
    %292 = vector.multi_reduction <maximumf>, %291, %cst_83 [1] : vector<8x16xf32> to vector<8xf32>
    %293 = vector.shape_cast %292 : vector<8xf32> to vector<8x1xf32>
    %294 = vector.broadcast %293 : vector<8x1xf32> to vector<8x16xf32>
    %295 = arith.subf %291, %294 : vector<8x16xf32>
    %296 = math.exp %295 : vector<8x16xf32>
    %cst_84 = arith.constant dense<0.000000e+00> : vector<8xf32>
    %297 = vector.multi_reduction <add>, %296, %cst_84 [1] : vector<8x16xf32> to vector<8xf32>
    %298 = vector.shape_cast %297 : vector<8xf32> to vector<8x1xf32>
    %299 = tpu.reciprocal %298 {approx = true} : vector<8x1xf32> -> vector<8x1xf32>
    %300 = vector.broadcast %299 : vector<8x1xf32> to vector<8x16xf32>
    %301 = arith.mulf %296, %300 : vector<8x16xf32>
    %302 = arith.truncf %301 : vector<8x16xf32> to vector<8x16xbf16>
    %303 = vector.extract_strided_slice %272 {offsets = [0, 32], sizes = [16, 32], strides = [1, 1]} : vector<16x128xbf16> to vector<16x32xbf16>
    %cst_85 = arith.constant dense<0.000000e+00> : vector<8x32xf32>
    %304 = tpu.matmul %302, %303, %cst_85 {dimension_numbers = #tpu.dot_dimension_numbers<[1], [0], [0], [1], [0, 0, 1, 1], [], []>} : vector<8x16xbf16>, vector<16x32xbf16>, vector<8x32xf32> -> vector<8x32xf32>
    %305 = arith.addf %288, %304 : vector<8x32xf32>
    %306 = vector.extract_strided_slice %270 {offsets = [0, 16], sizes = [8, 8], strides = [1, 1]} : vector<8x32xbf16> to vector<8x8xbf16>
    %307 = vector.extract_strided_slice %271 {offsets = [0, 16], sizes = [16, 8], strides = [1, 1]} : vector<16x32xbf16> to vector<16x8xbf16>
    %cst_86 = arith.constant dense<0.000000e+00> : vector<8x16xf32>
    %308 = tpu.matmul %306, %307, %cst_86 {dimension_numbers = #tpu.dot_dimension_numbers<[1], [1], [0], [0], [0, 0, 1, 0], [], []>} : vector<8x8xbf16>, vector<16x8xbf16>, vector<8x16xf32> -> vector<8x16xf32>
    %cst_87 = arith.constant dense<0xFF800000> : vector<8xf32>
    %309 = vector.multi_reduction <maximumf>, %308, %cst_87 [1] : vector<8x16xf32> to vector<8xf32>
    %310 = vector.shape_cast %309 : vector<8xf32> to vector<8x1xf32>
    %311 = vector.broadcast %310 : vector<8x1xf32> to vector<8x16xf32>
    %312 = arith.subf %308, %311 : vector<8x16xf32>
    %313 = math.exp %312 : vector<8x16xf32>
    %cst_88 = arith.constant dense<0.000000e+00> : vector<8xf32>
    %314 = vector.multi_reduction <add>, %313, %cst_88 [1] : vector<8x16xf32> to vector<8xf32>
    %315 = vector.shape_cast %314 : vector<8xf32> to vector<8x1xf32>
    %316 = tpu.reciprocal %315 {approx = true} : vector<8x1xf32> -> vector<8x1xf32>
    %317 = vector.broadcast %316 : vector<8x1xf32> to vector<8x16xf32>
    %318 = arith.mulf %313, %317 : vector<8x16xf32>
    %319 = arith.truncf %318 : vector<8x16xf32> to vector<8x16xbf16>
    %320 = vector.extract_strided_slice %272 {offsets = [0, 64], sizes = [16, 32], strides = [1, 1]} : vector<16x128xbf16> to vector<16x32xbf16>
    %cst_89 = arith.constant dense<0.000000e+00> : vector<8x32xf32>
    %321 = tpu.matmul %319, %320, %cst_89 {dimension_numbers = #tpu.dot_dimension_numbers<[1], [0], [0], [1], [0, 0, 1, 1], [], []>} : vector<8x16xbf16>, vector<16x32xbf16>, vector<8x32xf32> -> vector<8x32xf32>
    %322 = arith.addf %305, %321 : vector<8x32xf32>
    %323 = vector.extract_strided_slice %270 {offsets = [0, 24], sizes = [8, 8], strides = [1, 1]} : vector<8x32xbf16> to vector<8x8xbf16>
    %324 = vector.extract_strided_slice %271 {offsets = [0, 24], sizes = [16, 8], strides = [1, 1]} : vector<16x32xbf16> to vector<16x8xbf16>
    %cst_90 = arith.constant dense<0.000000e+00> : vector<8x16xf32>
    %325 = tpu.matmul %323, %324, %cst_90 {dimension_numbers = #tpu.dot_dimension_numbers<[1], [1], [0], [0], [0, 0, 1, 0], [], []>} : vector<8x8xbf16>, vector<16x8xbf16>, vector<8x16xf32> -> vector<8x16xf32>
    %cst_91 = arith.constant dense<0xFF800000> : vector<8xf32>
    %326 = vector.multi_reduction <maximumf>, %325, %cst_91 [1] : vector<8x16xf32> to vector<8xf32>
    %327 = vector.shape_cast %326 : vector<8xf32> to vector<8x1xf32>
    %328 = vector.broadcast %327 : vector<8x1xf32> to vector<8x16xf32>
    %329 = arith.subf %325, %328 : vector<8x16xf32>
    %330 = math.exp %329 : vector<8x16xf32>
    %cst_92 = arith.constant dense<0.000000e+00> : vector<8xf32>
    %331 = vector.multi_reduction <add>, %330, %cst_92 [1] : vector<8x16xf32> to vector<8xf32>
    %332 = vector.shape_cast %331 : vector<8xf32> to vector<8x1xf32>
    %333 = tpu.reciprocal %332 {approx = true} : vector<8x1xf32> -> vector<8x1xf32>
    %334 = vector.broadcast %333 : vector<8x1xf32> to vector<8x16xf32>
    %335 = arith.mulf %330, %334 : vector<8x16xf32>
    %336 = arith.truncf %335 : vector<8x16xf32> to vector<8x16xbf16>
    %337 = vector.extract_strided_slice %272 {offsets = [0, 96], sizes = [16, 32], strides = [1, 1]} : vector<16x128xbf16> to vector<16x32xbf16>
    %cst_93 = arith.constant dense<0.000000e+00> : vector<8x32xf32>
    %338 = tpu.matmul %336, %337, %cst_93 {dimension_numbers = #tpu.dot_dimension_numbers<[1], [0], [0], [1], [0, 0, 1, 1], [], []>} : vector<8x16xbf16>, vector<16x32xbf16>, vector<8x32xf32> -> vector<8x32xf32>
    %339 = arith.addf %322, %338 : vector<8x32xf32>
    %340 = tpu.concatenate %269, %339 in 0 : vector<8x32xf32>, vector<8x32xf32> -> vector<16x32xf32>
    %341 = vector.broadcast %197 : vector<1x32xf32> to vector<16x32xf32>
    %342 = arith.addf %340, %341 : vector<16x32xf32>
    %343 = arith.addf %181, %342 : vector<16x32xf32>
    %c9 = arith.constant 9 : index
    %c0_94 = arith.constant 0 : index
    %344 = vector.load %arg10[%c9, %c0_94] : memref<16x128xf32, #tpu.memory_space<vmem>>, vector<1x32xf32>
    %c10 = arith.constant 10 : index
    %c0_95 = arith.constant 0 : index
    %345 = vector.load %arg10[%c10, %c0_95] : memref<16x128xf32, #tpu.memory_space<vmem>>, vector<1x32xf32>
    %cst_96 = arith.constant dense<0.000000e+00> : vector<16xf32>
    %346 = vector.multi_reduction <add>, %343, %cst_96 [1] : vector<16x32xf32> to vector<16xf32>
    %347 = vector.shape_cast %346 : vector<16xf32> to vector<16x1xf32>
    %cst_97 = arith.constant 3.200000e+01 : f32
    %348 = vector.broadcast %cst_97 : f32 to vector<16x1xf32>
    %349 = arith.divf %347, %348 : vector<16x1xf32>
    %350 = vector.broadcast %349 : vector<16x1xf32> to vector<16x32xf32>
    %351 = arith.subf %343, %350 : vector<16x32xf32>
    %352 = arith.mulf %351, %351 : vector<16x32xf32>
    %cst_98 = arith.constant dense<0.000000e+00> : vector<16xf32>
    %353 = vector.multi_reduction <add>, %352, %cst_98 [1] : vector<16x32xf32> to vector<16xf32>
    %354 = vector.shape_cast %353 : vector<16xf32> to vector<16x1xf32>
    %cst_99 = arith.constant 3.200000e+01 : f32
    %355 = vector.broadcast %cst_99 : f32 to vector<16x1xf32>
    %356 = arith.divf %354, %355 : vector<16x1xf32>
    %cst_100 = arith.constant 9.99999974E-6 : f32
    %357 = vector.broadcast %cst_100 : f32 to vector<16x1xf32>
    %358 = arith.addf %356, %357 : vector<16x1xf32>
    %359 = math.rsqrt %358 : vector<16x1xf32>
    %360 = vector.broadcast %359 : vector<16x1xf32> to vector<16x32xf32>
    %361 = arith.mulf %351, %360 : vector<16x32xf32>
    %362 = vector.broadcast %344 : vector<1x32xf32> to vector<16x32xf32>
    %363 = arith.mulf %361, %362 : vector<16x32xf32>
    %364 = vector.broadcast %345 : vector<1x32xf32> to vector<16x32xf32>
    %365 = arith.addf %363, %364 : vector<16x32xf32>
    %366 = arith.truncf %365 : vector<16x32xf32> to vector<16x32xbf16>
    %c0_101 = arith.constant 0 : index
    %c0_102 = arith.constant 0 : index
    %367 = vector.load %arg8[%c0_101, %c0_102] : memref<32x64xbf16, #tpu.memory_space<vmem>>, vector<32x64xbf16>
    %cst_103 = arith.constant dense<0.000000e+00> : vector<16x64xf32>
    %368 = tpu.matmul %366, %367, %cst_103 {dimension_numbers = #tpu.dot_dimension_numbers<[1], [0], [0], [1], [0, 0, 1, 1], [], []>} : vector<16x32xbf16>, vector<32x64xbf16>, vector<16x64xf32> -> vector<16x64xf32>
    %c5 = arith.constant 5 : index
    %c0_104 = arith.constant 0 : index
    %369 = vector.load %arg10[%c5, %c0_104] : memref<16x128xf32, #tpu.memory_space<vmem>>, vector<1x64xf32>
    %370 = vector.broadcast %369 : vector<1x64xf32> to vector<16x64xf32>
    %371 = arith.addf %368, %370 : vector<16x64xf32>
    %cst_105 = arith.constant 0.000000e+00 : f32
    %372 = vector.broadcast %cst_105 : f32 to vector<16x64xf32>
    %373 = arith.maximumf %371, %372 : vector<16x64xf32>
    %374 = arith.truncf %373 : vector<16x64xf32> to vector<16x64xbf16>
    %c0_106 = arith.constant 0 : index
    %c0_107 = arith.constant 0 : index
    %375 = vector.load %arg9[%c0_106, %c0_107] : memref<64x32xbf16, #tpu.memory_space<vmem>>, vector<64x32xbf16>
    %cst_108 = arith.constant dense<0.000000e+00> : vector<16x32xf32>
    %376 = tpu.matmul %374, %375, %cst_108 {dimension_numbers = #tpu.dot_dimension_numbers<[1], [0], [0], [1], [0, 0, 1, 1], [], []>} : vector<16x64xbf16>, vector<64x32xbf16>, vector<16x32xf32> -> vector<16x32xf32>
    %c6 = arith.constant 6 : index
    %c0_109 = arith.constant 0 : index
    %377 = vector.load %arg10[%c6, %c0_109] : memref<16x128xf32, #tpu.memory_space<vmem>>, vector<1x32xf32>
    %378 = vector.broadcast %377 : vector<1x32xf32> to vector<16x32xf32>
    %379 = arith.addf %376, %378 : vector<16x32xf32>
    %380 = arith.addf %365, %379 : vector<16x32xf32>
    %c11 = arith.constant 11 : index
    %c0_110 = arith.constant 0 : index
    %381 = vector.load %arg10[%c11, %c0_110] : memref<16x128xf32, #tpu.memory_space<vmem>>, vector<1x32xf32>
    %c12 = arith.constant 12 : index
    %c0_111 = arith.constant 0 : index
    %382 = vector.load %arg10[%c12, %c0_111] : memref<16x128xf32, #tpu.memory_space<vmem>>, vector<1x32xf32>
    %cst_112 = arith.constant dense<0.000000e+00> : vector<16xf32>
    %383 = vector.multi_reduction <add>, %380, %cst_112 [1] : vector<16x32xf32> to vector<16xf32>
    %384 = vector.shape_cast %383 : vector<16xf32> to vector<16x1xf32>
    %cst_113 = arith.constant 3.200000e+01 : f32
    %385 = vector.broadcast %cst_113 : f32 to vector<16x1xf32>
    %386 = arith.divf %384, %385 : vector<16x1xf32>
    %387 = vector.broadcast %386 : vector<16x1xf32> to vector<16x32xf32>
    %388 = arith.subf %380, %387 : vector<16x32xf32>
    %389 = arith.mulf %388, %388 : vector<16x32xf32>
    %cst_114 = arith.constant dense<0.000000e+00> : vector<16xf32>
    %390 = vector.multi_reduction <add>, %389, %cst_114 [1] : vector<16x32xf32> to vector<16xf32>
    %391 = vector.shape_cast %390 : vector<16xf32> to vector<16x1xf32>
    %cst_115 = arith.constant 3.200000e+01 : f32
    %392 = vector.broadcast %cst_115 : f32 to vector<16x1xf32>
    %393 = arith.divf %391, %392 : vector<16x1xf32>
    %cst_116 = arith.constant 9.99999974E-6 : f32
    %394 = vector.broadcast %cst_116 : f32 to vector<16x1xf32>
    %395 = arith.addf %393, %394 : vector<16x1xf32>
    %396 = math.rsqrt %395 : vector<16x1xf32>
    %397 = vector.broadcast %396 : vector<16x1xf32> to vector<16x32xf32>
    %398 = arith.mulf %388, %397 : vector<16x32xf32>
    %399 = vector.broadcast %381 : vector<1x32xf32> to vector<16x32xf32>
    %400 = arith.mulf %398, %399 : vector<16x32xf32>
    %401 = vector.broadcast %382 : vector<1x32xf32> to vector<16x32xf32>
    %402 = arith.addf %400, %401 : vector<16x32xf32>
    %c0_117 = arith.constant 0 : index
    %c0_118 = arith.constant 0 : index
    %403 = vector.load %arg11[%c0_117, %c0_118] : memref<16x32xf32, #tpu.memory_space<vmem>>, vector<16x32xf32>
    tpu.vector_store %arg11[%c0_117, %c0_118], %402 {strides = array<i32>} : memref<16x32xf32, #tpu.memory_space<vmem>>, vector<16x32xf32>,
    return
  }
  func.func @transform_0(%arg0: i32) -> (i32, i32) {
    %c0_i32 = arith.constant 0 : i32
    %c0_i32_0 = arith.constant 0 : i32
    return %arg0, %c0_i32 : i32, i32
  }
  func.func @transform_1(%arg0: i32) -> (i32, i32) {
    %c0_i32 = arith.constant 0 : i32
    %c0_i32_0 = arith.constant 0 : i32
    return %arg0, %c0_i32 : i32, i32
  }
  func.func @transform_2(%arg0: i32) -> (i32, i32) {
    %c0_i32 = arith.constant 0 : i32
    %c0_i32_0 = arith.constant 0 : i32
    %c0_i32_1 = arith.constant 0 : i32
    return %c0_i32, %c0_i32_0 : i32, i32
  }
  func.func @transform_3(%arg0: i32) -> (i32, i32) {
    %c0_i32 = arith.constant 0 : i32
    %c0_i32_0 = arith.constant 0 : i32
    %c0_i32_1 = arith.constant 0 : i32
    return %c0_i32, %c0_i32_0 : i32, i32
  }
  func.func @transform_4(%arg0: i32) -> (i32, i32) {
    %c0_i32 = arith.constant 0 : i32
    %c0_i32_0 = arith.constant 0 : i32
    %c0_i32_1 = arith.constant 0 : i32
    return %c0_i32, %c0_i32_0 : i32, i32
  }
  func.func @transform_5(%arg0: i32) -> (i32, i32) {
    %c0_i32 = arith.constant 0 : i32
    %c0_i32_0 = arith.constant 0 : i32
    %c0_i32_1 = arith.constant 0 : i32
    return %c0_i32, %c0_i32_0 : i32, i32
  }
  func.func @transform_6(%arg0: i32) -> (i32, i32) {
    %c0_i32 = arith.constant 0 : i32
    %c0_i32_0 = arith.constant 0 : i32
    %c0_i32_1 = arith.constant 0 : i32
    return %c0_i32, %c0_i32_0 : i32, i32
  }
  func.func @transform_7(%arg0: i32) -> (i32, i32) {
    %c0_i32 = arith.constant 0 : i32
    %c0_i32_0 = arith.constant 0 : i32
    %c0_i32_1 = arith.constant 0 : i32
    return %c0_i32, %c0_i32_0 : i32, i32
  }
  func.func @transform_8(%arg0: i32) -> (i32, i32) {
    %c0_i32 = arith.constant 0 : i32
    %c0_i32_0 = arith.constant 0 : i32
    %c0_i32_1 = arith.constant 0 : i32
    return %c0_i32, %c0_i32_0 : i32, i32
  }
  func.func @transform_9(%arg0: i32) -> (i32, i32) {
    %c0_i32 = arith.constant 0 : i32
    %c0_i32_0 = arith.constant 0 : i32
    %c0_i32_1 = arith.constant 0 : i32
    return %c0_i32, %c0_i32_0 : i32, i32
  }
  func.func @transform_10(%arg0: i32) -> (i32, i32) {
    %c0_i32 = arith.constant 0 : i32
    %c0_i32_0 = arith.constant 0 : i32
    return %arg0, %c0_i32 : i32, i32
  }
}

</mosaic_0001>

<bundles_post_ra>
// kernel: _decoder_block_jit.1
= control target key start
LH: loop header
LB: loop body
LE: loop exit
PB: predicated region body
PF: predicated region fallthrough
CT: control target
= control target key end

     0   :  { %v2977_v1 = vmov 0.0   ;;  %vm2978_vm0 = vmmov 0   ;;  %vm65_vm1 = vcmask 261120   ;;  %s3526_s0 = inlined_call_operand.vmem [shape: f32[16,32], index: 0, kind: input, shape index: {}]   ;;  %s3527_s1 = inlined_call_operand.vmem [shape: f32[32,32], index: 1, kind: input, shape index: {}]   ;;  %s3528_s2 = inlined_call_operand.vmem [shape: bf16[32,64], index: 2, kind: input, shape index: {}]   ;;  %s3529_s3 = inlined_call_operand.vmem [shape: bf16[32,128], index: 3, kind: input, shape index: {}]   ;;  %s3530_s4 = inlined_call_operand.vmem [shape: bf16[32,32], index: 4, kind: input, shape index: {}]   ;;  %s3531_s5 = inlined_call_operand.vmem [shape: bf16[32,32], index: 5, kind: input, shape index: {}]   ;;  %s3532_s6 = inlined_call_operand.vmem [shape: bf16[32,128], index: 6, kind: input, shape index: {}]   ;;  %s3533_s7 = inlined_call_operand.vmem [shape: bf16[32,64], index: 7, kind: input, shape index: {}]   ;;  %s3534_s8 = inlined_call_operand.vmem [shape: bf16[64,32], index: 8, kind: input, shape index: {}]   ;;  %s3535_s9 = inlined_call_operand.vmem [shape: f32[16,128], index: 9, kind: input, shape index: {}]   ;;  %s3536_s10 = inlined_call_operand.hbm [shape: f32[16,32], index: 10, kind: output, shape index: {}]  }
   0x1   :  { %v2861_v0 = vld [vmem:[%s3528_s2] sm:$0xff]   ;;  %2595 = vmatprep.subr.bf16.mxu1 %v2977_v1  ;;  %2611 = vmatprep.subr.bf16.mxu0 %v2977_v1  ;;  %v2862_v2 = vld [vmem:[%s3528_s2 + $0x8] sm:$0xff]  }
   0x2   :  { %2596 = vmatpush3.bf16.msra.mxu1 %v2861_v0  ;;  %2599 = vmatprep.mubr.msk.bf16.mxu1 %vm2978_vm0, %v2977_v1  ;;  %v3059_v3 = vld [vmem:[%s3526_s0] sm:$0xff]  ;;  %v3064_v4 = vld [vmem:[%s3526_s0 + $0x8] sm:$0xff] }
   0x3   :  { %2597 = vmatprep.subr.bf16.mxu1 %v2977_v1  ;;  %2613 = vmatprep.mubr.msk.bf16.mxu0 %vm2978_vm0, %v2977_v1  ;;  %v43_v5 = vpack.c.bf16 %v3064_v4, %v3059_v3 }
   0x6   :  { %2598 = vmatpush3.bf16.msra.mxu1 %v2862_v2 }
   0x7   :  { %2603 = vmatprep.subr.bf16.mxu1 %v2977_v1 }
   0x9   :  { %2600 = vmatmul.mubr.msk.bf16.vlgmr.msra.gmra.mrb[0].mxu1 %vm65_vm1, %v43_v5 }
   0xa   :  { %2607 = vmatprep.mubr.msk.bf16.mxu1 %vm2978_vm0, %v2977_v1 }
   0xb   :  { %15 = vsyncpa [#allocation3], 0  ;;  %v2863_v6 = vld [vmem:[%s3529_s3] sm:$0xff]   ;;  %v2864_v7 = vld [vmem:[%s3529_s3 + $0x8] sm:$0xff]   ;;  %s2979_s3 = smov 88   ;;  %s2980_s25 = smov 120  }
   0xc   :  { %2604 = vmatpush3.bf16.msra.mxu1 %v2863_v6  ;;  %v2436_v8 = vld [vmem:[%s3535_s9] ss:$0 sm:$0xff]  ;;  %s2981_s26 = smov 96   ;;  %s2982_s27 = smov 80   ;;  %vm173_vm2 = vcmask 64512   ;;  %vm300_vm3 = vcmask 1043456  }
   0xd   :  { %2605 = vmatprep.subr.bf16.mxu1 %v2977_v1  ;;  %s2983_s28 = smov 112   ;;  %s2984_s29 = smov 72   ;;  %vm1362_vm4 = vcmask 130048   ;;  %vm2331_vm5 = vcmask 523264  }
   0xe   :  { %s2985_s30 = smov 104   ;;  %s2986_s11 = smov 32  }
   0xf   :  { %s2987_s12 = smov 64   ;;  %s2988_s20 = smov [#allocation2]  }
  0x10   :  { %2606 = vmatpush3.bf16.msra.mxu1 %v2864_v7  ;;  %s2425_s0 = sshll.u32 %s2988_s20, 4  ;;  %s2426_s0 = int_to_ptr.vmem [resolvable:$true] %s2425_s0 }
  0x11   :  { %2617 = vmatprep.subr.bf16.mxu1 %v2977_v1  ;;  %s2953_s2 = scalar_lea.vmem %s2426_s0, 256  ;;  %p2958_p1 = scmp.lt.s32.totalorder %s2426_s0, %s2426_s0 }
  0x12   :  { %p2954_p0 = scmp.ne.s32.totalorder %s2426_s0, %s2953_s2  ;;  %p2959_p2 = scmp.lt.s32.totalorder %s2953_s2, %s2953_s2 }
  0x13   :  { %2608 = vmatmul.mubr.msk.bf16.vlgmr.msra.gmra.mrb[4].mxu1 %vm65_vm1, %v43_v5 }
  0x14   :  { %2619 = vmatprep.mubr.msk.bf16.mxu1 %vm2978_vm0, %v2977_v1  ;;  %p2960_p3 = por %p2959_p2, %p2958_p1 }
  0x16   :  { %p2961_p4 = pnand %p2960_p3, %p2954_p0 }
  0xdc   :  { %v103_v9 = vpop.f32.mrb[0].mxu1 }
  0xdd   :  { %v2601_v10 = vpop.f32.mrb[1].mxu1  ;;  %v104_v12 = vadd.f32 %v2436_v8, %v103_v9 }
  0xde   :  { %v106_v11 = vpop.f32.mrb[2].mxu1 }
  0xdf   :  { %v107_v13 = vadd.f32 %v2436_v8, %v106_v11  ;;  %v2602_v14 = vpop.f32.mrb[3].mxu1 }
  0xe1   :  { %v3089_v15 = vpack.c.bf16 %v107_v13, %v104_v12 }
  0xe3   :  { %234 = vrot.lane.b32.xlu0 %v3089_v15, %s2979_s3 }
  0xe6   :  { %v160_v18 = vpop.f32.mrb[4].mxu1 }
  0xe7   :  { %232 = vrot.lane.b32.xlu0 %v3089_v15, %s2980_s25  ;;  %v2609_v19 = vpop.f32.mrb[5].mxu1 }
  0xe8   :  { %v163_v21 = vpop.f32.mrb[6].mxu1 }
  0xe9   :  { %v3107_v22 = vpack.c.bf16 %v163_v21, %v160_v18  ;;  %v2610_v23 = vpop.f32.mrb[7].mxu1 }
  0xeb   :  { %171 = vrot.lane.b32.xlu0 %v3089_v15, %s2981_s26  ;;  %v348_v24 = vsel %vm300_vm3, %v3107_v22, 0 }
  0xef   :  { %392 = vrot.lane.b32.xlu0 %v3089_v15, %s2982_s27 }
  0xf3   :  { %390 = vrot.lane.b32.xlu0 %v3089_v15, %s2983_s28 }
  0xf7   :  { %503 = vrot.lane.b32.xlu0 %v3089_v15, %s2984_s29 }
  0xfb   :  { %501 = vrot.lane.b32.xlu0 %v3089_v15, %s2985_s30 }
 0x155   :  { %v235_v16 = vpop.permute.xlu0 %234 }
 0x156   :  { %v240_v17 = vsel %vm173_vm2, %v235_v16, 0 }
 0x157   :  { %2618 = vmatpush3.bf16.xpose.msra.mxu1 %v240_v17 }
 0x158   :  { %2629 = vmatprep.subr.bf16.mxu1 %v2977_v1 }
 0x159   :  { %v233_v20 = vpop.permute.xlu0 %232 }
 0x15d   :  { %v172_v25 = vpop.permute.xlu0 %171 }
 0x15e   :  { %2620 = vmatmul.mubr.msk.bf16.vlgmr.msra.gmra.mrb[8].mxu1 %vm173_vm2, %v233_v20  ;;  %v178_v26 = vsel %vm173_vm2, %v172_v25, 0 }
 0x15f   :  { %2612 = vmatpush3.bf16.xpose.msra.mxu0 %v178_v26  ;;  %2630 = vmatpush3.bf16.msra.mxu1 %v348_v24 }
 0x160   :  { %2623 = vmatprep.subr.bf16.mxu0 %v2977_v1  ;;  %2631 = vmatprep.mubr.msk.bf16.mxu1 %vm2978_vm0, %v2977_v1 }
 0x161   :  { %2641 = vmatprep.subr.bf16.mxu1 %v2977_v1  ;;  %v393_v45 = vpop.permute.xlu0 %392 }
 0x162   :  { %v398_v50 = vsel %vm173_vm2, %v393_v45, 0 }
 0x165   :  { %v391_v49 = vpop.permute.xlu0 %390 }
 0x166   :  { %2614 = vmatmul.mubr.msk.bf16.vlgmr.msra.gmra.mrb[0].mxu0 %vm173_vm2, %v3089_v15 }
 0x167   :  { %2625 = vmatprep.mubr.msk.bf16.mxu0 %vm2978_vm0, %v2977_v1 }
 0x169   :  { %v504_v51 = vpop.permute.xlu0 %503 }
 0x16a   :  { %v509_v52 = vsel %vm173_vm2, %v504_v51, 0 }
 0x16d   :  { %v502_v53 = vpop.permute.xlu0 %501 }
 0x231   :  { %v276_v27 = vpop.f32.mrb[8].mxu1 }
 0x232   :  { %v2621_v28 = vpop.f32.mrb[9].mxu1  ;;  %v282_v29 = vsel %vm173_vm2, %v276_v27, -inf }
 0x233   :  { %283 = vmax.xlane.f32.xlu1 %v282_v29  ;;  %v279_v30 = vpop.f32.mrb[10].mxu1  ;;  %v3154_v28 = vrot.slane %v3089_v15, 4 }
 0x234   :  { %v2622_v31 = vpop.f32.mrb[11].mxu1 }
 0x239   :  { %v214_v32 = vpop.f32.mrb[0].mxu0 }
 0x23a   :  { %v2615_v33 = vpop.f32.mrb[1].mxu0  ;;  %v220_v41 = vsel %vm173_vm2, %v214_v32, -inf }
 0x23b   :  { %v217_v34 = vpop.f32.mrb[2].mxu0 }
 0x23c   :  { %v2616_v35 = vpop.f32.mrb[3].mxu0 }
 0x2c0   :  { %v284_v36 = vpop.xlane.xlu1 %283 }
 0x2c1   :  { %v285_v37 = vsub.f32 %v276_v27, %v284_v36 }
 0x2c3   :  { %v286_v38 = vmul.f32 1.442695, %v285_v37 }
 0x2c5   :  { %2877 = vpow2.f32 %v286_v38 }
 0x2cf   :  { %v2878_v39 = vpop.eup %2877 }
 0x2d0   :  { %v288_v40 = vsel %vm173_vm2, %v2878_v39, 0.0 }
 0x2d1   :  { %289 = vadd.xlane.f32.xlu1 %v288_v40 }
 0x2e2   :  { %295 = vrot.lane.b32.xlu1 %v3107_v22, %s2981_s26 }
 0x306   :  { %221 = vmax.xlane.f32.xlu1 %v220_v41 }
 0x35e   :  { %v290_v42 = vpop.xlane.xlu1 %289 }
 0x35f   :  { %2879 = vrcp.f32 %v290_v42 }
 0x362   :  { %v296_v43 = vpop.permute.xlu1 %295 }
 0x363   :  { %v302_v44 = vsel %vm300_vm3, %v296_v43, 0 }
 0x364   :  { %2624 = vmatpush3.bf16.msra.mxu0 %v302_v44 }
 0x365   :  { %2635 = vmatprep.subr.bf16.mxu0 %v2977_v1 }
 0x369   :  { %v2880_v46 = vpop.eup %2879 }
 0x36a   :  { %v292_v47 = vmul.f32 %v2880_v46, %v2878_v39 }
 0x36c   :  { %v293_v48 = vpack.c.bf16 %v292_v47, %v292_v47  ;;  %v3173_v47 = vrot.slane %v3107_v22, 4 }
 0x36e   :  { %2626 = vmatmul.mubr.msk.bf16.vlgmr.msra.gmra.mrb[4].mxu0 %vm173_vm2, %v293_v48 }
 0x36f   :  { %2636 = vmatpush3.bf16.xpose.msra.mxu0 %v398_v50  ;;  %2637 = vmatprep.mubr.msk.bf16.mxu0 %vm2978_vm0, %v2977_v1 }
 0x370   :  { %2647 = vmatprep.subr.bf16.mxu0 %v2977_v1 }
 0x376   :  { %2638 = vmatmul.mubr.msk.bf16.vlgmr.msra.gmra.mrb[8].mxu0 %vm173_vm2, %v391_v49  ;;  %v788_v49 = vsel %vm300_vm3, %v3173_v47, 0 }
 0x377   :  { %2648 = vmatpush3.bf16.xpose.msra.mxu0 %v509_v52  ;;  %2649 = vmatprep.mubr.msk.bf16.mxu0 %vm2978_vm0, %v2977_v1 }
 0x378   :  { %2659 = vmatprep.subr.bf16.mxu0 %v2977_v1 }
 0x37e   :  { %2650 = vmatmul.mubr.msk.bf16.vlgmr.msra.gmra.mrb[12].mxu0 %vm173_vm2, %v502_v53 }
 0x37f   :  { %2661 = vmatprep.mubr.msk.bf16.mxu0 %vm2978_vm0, %v2977_v1 }
 0x393   :  { %v222_v54 = vpop.xlane.xlu1 %221 }
 0x394   :  { %v223_v55 = vsub.f32 %v214_v32, %v222_v54 }
 0x396   :  { %v224_v56 = vmul.f32 1.442695, %v223_v55 }
 0x398   :  { %2881 = vpow2.f32 %v224_v56 }
 0x3a2   :  { %v2882_v57 = vpop.eup %2881 }
 0x3a3   :  { %v226_v58 = vsel %vm173_vm2, %v2882_v57, 0.0 }
 0x3a4   :  { %227 = vadd.xlane.f32.xlu1 %v226_v58 }
 0x3b5   :  { %563 = vrot.lane.b32.xlu1 %v3107_v22, %s2986_s11 }
 0x431   :  { %v228_v59 = vpop.xlane.xlu1 %227 }
 0x432   :  { %2883 = vrcp.f32 %v228_v59 }
 0x435   :  { %v564_v35 = vpop.permute.xlu1 %563 }
 0x436   :  { %v569_v41 = vsel %vm300_vm3, %v564_v35, 0 }
 0x43c   :  { %v2884_v60 = vpop.eup %2883 }
 0x43d   :  { %v230_v61 = vmul.f32 %v2884_v60, %v2882_v57 }
 0x43f   :  { %v231_v62 = vpack.c.bf16 %v230_v61, %v230_v61 }
 0x441   :  { %v338_v63 = vpop.f32.mrb[4].mxu0  ;;  %2632 = vmatmul.mubr.msk.bf16.vlgmr.msra.gmra.mrb[12].mxu1 %vm173_vm2, %v231_v62 }
 0x442   :  { %v2627_v0 = vpop.f32.mrb[5].mxu0  ;;  %2643 = vmatprep.mubr.msk.bf16.mxu1 %vm2978_vm0, %v2977_v1 }
 0x443   :  { %v341_v2 = vpop.f32.mrb[6].mxu0 }
 0x444   :  { %v2628_v5 = vpop.f32.mrb[7].mxu0 }
 0x449   :  { %v434_v6 = vpop.f32.mrb[8].mxu0 }
 0x44a   :  { %v2639_v7 = vpop.f32.mrb[9].mxu0  ;;  %v440_v8 = vsel %vm173_vm2, %v434_v6, -inf }
 0x44b   :  { %441 = vmax.xlane.f32.xlu0 %v440_v8  ;;  %v437_v9 = vpop.f32.mrb[10].mxu0 }
 0x44c   :  { %v2640_v10 = vpop.f32.mrb[11].mxu0 }
 0x451   :  { %v545_v11 = vpop.f32.mrb[12].mxu0 }
 0x452   :  { %v2651_v12 = vpop.f32.mrb[13].mxu0  ;;  %v551_v13 = vsel %vm173_vm2, %v545_v11, -inf }
 0x453   :  { %552 = vmax.xlane.f32.xlu0 %v551_v13  ;;  %v548_v14 = vpop.f32.mrb[14].mxu0 }
 0x454   :  { %v2652_v16 = vpop.f32.mrb[15].mxu0 }
 0x4d8   :  { %v442_v17 = vpop.xlane.xlu0 %441 }
 0x4d9   :  { %v443_v18 = vsub.f32 %v434_v6, %v442_v17 }
 0x4db   :  { %v444_v19 = vmul.f32 1.442695, %v443_v18 }
 0x4dd   :  { %2885 = vpow2.f32 %v444_v19 }
 0x4e0   :  { %v553_v20 = vpop.xlane.xlu0 %552 }
 0x4e1   :  { %v554_v21 = vsub.f32 %v545_v11, %v553_v20 }
 0x4e3   :  { %v555_v23 = vmul.f32 1.442695, %v554_v21 }
 0x4e5   :  { %2887 = vpow2.f32 %v555_v23 }
 0x4e7   :  { %v2886_v24 = vpop.eup %2885 }
 0x4e8   :  { %v446_v25 = vsel %vm173_vm2, %v2886_v24, 0.0 }
 0x4e9   :  { %447 = vadd.xlane.f32.xlu0 %v446_v25 }
 0x4ef   :  { %v2888_v26 = vpop.eup %2887 }
 0x4f0   :  { %v557_v27 = vsel %vm173_vm2, %v2888_v26, 0.0 }
 0x4f1   :  { %558 = vadd.xlane.f32.xlu1 %v557_v27 }
 0x4ff   :  { %452 = vrot.lane.b32.xlu0 %v3107_v22, %s2987_s12 }
 0x502   :  { %675 = vrot.lane.b32.xlu1 %v3154_v28, %s2979_s3 }
 0x503   :  { %673 = vrot.lane.b32.xlu0 %v3154_v28, %s2980_s25 }
 0x514   :  { %v384_v29 = vpop.f32.mrb[12].mxu1 }
 0x515   :  { %v385_v30 = vadd.f32 %v384_v29, %v338_v63  ;;  %v2633_v31 = vpop.f32.mrb[13].mxu1 }
 0x516   :  { %v387_v32 = vpop.f32.mrb[14].mxu1 }
 0x517   :  { %v2634_v33 = vpop.f32.mrb[15].mxu1 }
 0x576   :  { %v448_v34 = vpop.xlane.xlu0 %447 }
 0x577   :  { %2889 = vrcp.f32 %v448_v34 }
 0x57a   :  { %v453_v36 = vpop.permute.xlu0 %452 }
 0x57b   :  { %v458_v37 = vsel %vm300_vm3, %v453_v36, 0 }
 0x57c   :  { %2642 = vmatpush3.bf16.msra.mxu1 %v458_v37 }
 0x57d   :  { %2653 = vmatprep.subr.bf16.mxu1 %v2977_v1 }
 0x57e   :  { %v559_v15 = vpop.xlane.xlu1 %558  ;;  %v674_v48 = vpop.permute.xlu0 %673 }
 0x57f   :  { %2891 = vrcp.f32 %v559_v15 }
 0x581   :  { %v2890_v38 = vpop.eup %2889 }
 0x582   :  { %v450_v39 = vmul.f32 %v2890_v38, %v2886_v24  ;;  %v676_v44 = vpop.permute.xlu1 %675 }
 0x583   :  { %v681_v46 = vsel %vm173_vm2, %v676_v44, 0 }
 0x584   :  { %v451_v40 = vpack.c.bf16 %v450_v39, %v450_v39 }
 0x586   :  { %2644 = vmatmul.mubr.msk.bf16.vlgmr.msra.gmra.mrb[16].mxu1 %vm173_vm2, %v451_v40 }
 0x587   :  { %2654 = vmatpush3.bf16.msra.mxu1 %v569_v41  ;;  %2655 = vmatprep.mubr.msk.bf16.mxu1 %vm2978_vm0, %v2977_v1 }
 0x588   :  { %2665 = vmatprep.subr.bf16.mxu1 %v2977_v1 }
 0x589   :  { %v2892_v42 = vpop.eup %2891 }
 0x58a   :  { %v561_v43 = vmul.f32 %v2892_v42, %v2888_v26 }
 0x58c   :  { %v562_v45 = vpack.c.bf16 %v561_v43, %v561_v43 }
 0x58e   :  { %2656 = vmatmul.mubr.msk.bf16.vlgmr.msra.gmra.mrb[20].mxu1 %vm173_vm2, %v562_v45 }
 0x58f   :  { %2667 = vmatprep.mubr.msk.bf16.mxu1 %vm2978_vm0, %v2977_v1 }
 0x590   :  { %2666 = vmatpush3.bf16.xpose.msra.mxu1 %v681_v46 }
 0x591   :  { %2677 = vmatprep.subr.bf16.mxu1 %v2977_v1 }
 0x597   :  { %2668 = vmatmul.mubr.msk.bf16.vlgmr.msra.gmra.mrb[24].mxu1 %vm173_vm2, %v674_v48 }
 0x598   :  { %2678 = vmatpush3.bf16.msra.mxu1 %v788_v49  ;;  %2679 = vmatprep.mubr.msk.bf16.mxu1 %vm2978_vm0, %v2977_v1 }
 0x599   :  { %2689 = vmatprep.subr.bf16.mxu1 %v2977_v1 }
 0x659   :  { %v494_v50 = vpop.f32.mrb[16].mxu1 }
 0x65a   :  { %v500_v51 = vadd.f32 %v494_v50, %v385_v30  ;;  %v2645_v52 = vpop.f32.mrb[17].mxu1 }
 0x65b   :  { %v497_v53 = vpop.f32.mrb[18].mxu1 }
 0x65c   :  { %v2646_v54 = vpop.f32.mrb[19].mxu1 }
 0x661   :  { %v605_v55 = vpop.f32.mrb[20].mxu1 }
 0x662   :  { %v3181_v22 = vadd.f32 %v605_v55, %v500_v51  ;;  %v2657_v56 = vpop.f32.mrb[21].mxu1 }
 0x663   :  { %v608_v57 = vpop.f32.mrb[22].mxu1 }
 0x664   :  { %v2658_v58 = vpop.f32.mrb[23].mxu1 }
 0x665   :  { %v2459_v58 = vld [vmem:[%s3535_s9 + $0x1] ss:$0 sm:$0xff] }
 0x66a   :  { %v717_v59 = vpop.f32.mrb[24].mxu1 }
 0x66b   :  { %v2669_v60 = vpop.f32.mrb[25].mxu1  ;;  %v723_v61 = vsel %vm173_vm2, %v717_v59, -inf }
 0x66c   :  { %724 = vmax.xlane.f32.xlu1 %v723_v61  ;;  %v720_v62 = vpop.f32.mrb[26].mxu1 }
 0x66d   :  { %v2670_v63 = vpop.f32.mrb[27].mxu1 }
 0x67d   :  { %736 = vrot.lane.b32.xlu1 %v3173_v47, %s2981_s26 }
 0x681   :  { %832 = vrot.lane.b32.xlu1 %v3154_v28, %s2982_s27 }
 0x685   :  { %943 = vrot.lane.b32.xlu1 %v3154_v28, %s2984_s29 }
 0x6f9   :  { %v725_v0 = vpop.xlane.xlu1 %724 }
 0x6fa   :  { %v726_v2 = vsub.f32 %v717_v59, %v725_v0  ;;  %v1056_v59 = vadd.f32 %v2459_v58, %v3181_v22 }
 0x6fc   :  { %v727_v5 = vmul.f32 1.442695, %v726_v2  ;;  %v1058_v60 = vadd.f32 %v1056_v59, %v3059_v3 }
 0x6fd   :  { %v737_v11 = vpop.permute.xlu1 %736 }
 0x6fe   :  { %2893 = vpow2.f32 %v727_v5  ;;  %v742_v13 = vsel %vm300_vm3, %v737_v11, 0  ;;  %v1062_v61 = vsel %vm65_vm1, %v1058_v60, 0.0 }
 0x701   :  { %v833_v16 = vpop.permute.xlu1 %832 }
 0x702   :  { %v838_v18 = vsel %vm173_vm2, %v833_v16, 0 }
 0x705   :  { %v944_v19 = vpop.permute.xlu1 %943 }
 0x706   :  { %v949_v21 = vsel %vm173_vm2, %v944_v19, 0 }
 0x708   :  { %v2894_v6 = vpop.eup %2893 }
 0x709   :  { %v729_v7 = vsel %vm173_vm2, %v2894_v6, 0.0 }
 0x70a   :  { %730 = vadd.xlane.f32.xlu0 %v729_v7 }
 0x720   :  { %613 = vrot.lane.b32.xlu0 %v3154_v28, %s2981_s26 }
 0x724   :  { %830 = vrot.lane.b32.xlu0 %v3154_v28, %s2983_s28 }
 0x728   :  { %941 = vrot.lane.b32.xlu0 %v3154_v28, %s2985_s30 }
 0x797   :  { %v731_v8 = vpop.xlane.xlu0 %730 }
 0x798   :  { %2895 = vrcp.f32 %v731_v8 }
 0x79b   :  { %v614_v9 = vpop.permute.xlu0 %613 }
 0x79c   :  { %v619_v10 = vsel %vm173_vm2, %v614_v9, 0 }
 0x79d   :  { %2660 = vmatpush3.bf16.xpose.msra.mxu0 %v619_v10 }
 0x79e   :  { %2671 = vmatprep.subr.bf16.mxu0 %v2977_v1 }
 0x79f   :  { %v831_v20 = vpop.permute.xlu0 %830 }
 0x7a2   :  { %v2896_v12 = vpop.eup %2895 }
 0x7a3   :  { %v733_v14 = vmul.f32 %v2896_v12, %v2894_v6  ;;  %v942_v23 = vpop.permute.xlu0 %941 }
 0x7a4   :  { %2662 = vmatmul.mubr.msk.bf16.vlgmr.msra.gmra.mrb[16].mxu0 %vm173_vm2, %v3154_v28 }
 0x7a5   :  { %2672 = vmatpush3.bf16.msra.mxu0 %v742_v13  ;;  %2673 = vmatprep.mubr.msk.bf16.mxu0 %vm2978_vm0, %v2977_v1  ;;  %v734_v17 = vpack.c.bf16 %v733_v14, %v733_v14 }
 0x7a6   :  { %2683 = vmatprep.subr.bf16.mxu0 %v2977_v1 }
 0x7ac   :  { %2674 = vmatmul.mubr.msk.bf16.vlgmr.msra.gmra.mrb[20].mxu0 %vm173_vm2, %v734_v17 }
 0x7ad   :  { %2685 = vmatprep.mubr.msk.bf16.mxu0 %vm2978_vm0, %v2977_v1 }
 0x7ae   :  { %2684 = vmatpush3.bf16.xpose.msra.mxu0 %v838_v18 }
 0x7af   :  { %2695 = vmatprep.subr.bf16.mxu0 %v2977_v1 }
 0x7b5   :  { %2686 = vmatmul.mubr.msk.bf16.vlgmr.msra.gmra.mrb[24].mxu0 %vm173_vm2, %v831_v20 }
 0x7b6   :  { %2696 = vmatpush3.bf16.xpose.msra.mxu0 %v949_v21  ;;  %2697 = vmatprep.mubr.msk.bf16.mxu0 %vm2978_vm0, %v2977_v1 }
 0x7b7   :  { %2707 = vmatprep.subr.bf16.mxu0 %v2977_v1 }
 0x7bd   :  { %2698 = vmatmul.mubr.msk.bf16.vlgmr.msra.gmra.mrb[28].mxu0 %vm173_vm2, %v942_v23 }
 0x7be   :  { %2711 = vmatprep.mubr.msk.bf16.mxu0 %vm2978_vm0, %v2977_v1 }
 0x877   :  { %v655_v24 = vpop.f32.mrb[16].mxu0 }
 0x878   :  { %v2663_v25 = vpop.f32.mrb[17].mxu0  ;;  %v661_v26 = vsel %vm173_vm2, %v655_v24, -inf }
 0x879   :  { %662 = vmax.xlane.f32.xlu1 %v661_v26  ;;  %v658_v27 = vpop.f32.mrb[18].mxu0 }
 0x87a   :  { %v2664_v28 = vpop.f32.mrb[19].mxu0 }
 0x87f   :  { %v3219_v29 = vpop.f32.mrb[20].mxu0 }
 0x880   :  { %v2675_v30 = vpop.f32.mrb[21].mxu0 }
 0x881   :  { %v781_v31 = vpop.f32.mrb[22].mxu0 }
 0x882   :  { %v2676_v32 = vpop.f32.mrb[23].mxu0 }
 0x888   :  { %v874_v33 = vpop.f32.mrb[24].mxu0 }
 0x889   :  { %v2687_v34 = vpop.f32.mrb[25].mxu0  ;;  %v880_v35 = vsel %vm173_vm2, %v874_v33, -inf }
 0x88a   :  { %881 = vmax.xlane.f32.xlu0 %v880_v35  ;;  %v877_v36 = vpop.f32.mrb[26].mxu0 }
 0x88b   :  { %v2688_v37 = vpop.f32.mrb[27].mxu0 }
 0x890   :  { %v985_v15 = vpop.f32.mrb[28].mxu0 }
 0x891   :  { %v2699_v38 = vpop.f32.mrb[29].mxu0  ;;  %v991_v39 = vsel %vm173_vm2, %v985_v15, -inf }
 0x892   :  { %992 = vmax.xlane.f32.xlu0 %v991_v39  ;;  %v988_v40 = vpop.f32.mrb[30].mxu0 }
 0x893   :  { %v2700_v41 = vpop.f32.mrb[31].mxu0 }
 0x906   :  { %v663_v42 = vpop.xlane.xlu1 %662 }
 0x907   :  { %v664_v43 = vsub.f32 %v655_v24, %v663_v42 }
 0x909   :  { %v665_v44 = vmul.f32 1.442695, %v664_v43  ;;  %v2865_v43 = vld [vmem:[%s3531_s5] sm:$0xff]  }
 0x90b   :  { %2897 = vpow2.f32 %v665_v44  ;;  %v39_v44 = vld [vmem:[%s3527_s1] sm:$0xff] }
 0x915   :  { %v2898_v45 = vpop.eup %2897 }
 0x916   :  { %v667_v46 = vsel %vm173_vm2, %v2898_v45, 0.0 }
 0x917   :  { %v882_v48 = vpop.xlane.xlu0 %881  ;;  %668 = vadd.xlane.f32.xlu1 %v667_v46 }
 0x918   :  { %v883_v49 = vsub.f32 %v874_v33, %v882_v48  ;;  %v41_v48 = vld [vmem:[%s3527_s1 + $0x10] sm:$0xff] }
 0x91a   :  { %v884_v50 = vmul.f32 1.442695, %v883_v49  ;;  %v42_v49 = vld [vmem:[%s3527_s1 + $0x18] sm:$0xff] }
 0x91c   :  { %2899 = vpow2.f32 %v884_v50  ;;  %v1103_v50 = vpack.c.bf16 %v42_v49, %v41_v48 }
 0x91f   :  { %v993_v51 = vpop.xlane.xlu0 %992 }
 0x920   :  { %v994_v52 = vsub.f32 %v985_v15, %v993_v51  ;;  %v2867_v51 = vld [vmem:[%s3530_s4] sm:$0xff]  }
 0x921   :  { %2708 = vmatpush3.bf16.msra.mxu0 %v2867_v51 }
 0x922   :  { %v995_v53 = vmul.f32 1.442695, %v994_v52  ;;  %v2868_v52 = vld [vmem:[%s3530_s4 + $0x8] sm:$0xff]   ;;  %2709 = vmatprep.subr.bf16.mxu0 %v2977_v1 }
 0x924   :  { %2901 = vpow2.f32 %v995_v53 }
 0x925   :  { %2710 = vmatpush3.bf16.msra.mxu0 %v2868_v52 }
 0x926   :  { %v2900_v54 = vpop.eup %2899 }
 0x927   :  { %v886_v55 = vsel %vm173_vm2, %v2900_v54, 0.0 }
 0x928   :  { %887 = vadd.xlane.f32.xlu0 %v886_v55 }
 0x92e   :  { %v2902_v56 = vpop.eup %2901 }
 0x92f   :  { %v997_v57 = vsel %vm173_vm2, %v2902_v56, 0.0 }
 0x930   :  { %998 = vadd.xlane.f32.xlu1 %v997_v57 }
 0x93e   :  { %892 = vrot.lane.b32.xlu0 %v3173_v47, %s2987_s12 }
 0x941   :  { %1003 = vrot.lane.b32.xlu1 %v3173_v47, %s2986_s11 }
 0x965   :  { %1063 = vadd.xlane.f32.xlu1 %v1062_v61  ;;  %v2460_v61 = vld [vmem:[%s3535_s9 + $0x7] ss:$0 sm:$0xff] }
 0x9a4   :  { %v669_v62 = vpop.xlane.xlu1 %668 }
 0x9a5   :  { %2903 = vrcp.f32 %v669_v62 }
 0x9af   :  { %v2904_v63 = vpop.eup %2903 }
 0x9b0   :  { %v671_v0 = vmul.f32 %v2904_v63, %v2898_v45  ;;  %v40_v45 = vld [vmem:[%s3527_s1 + $0x8] sm:$0xff] }
 0x9b1   :  { %v1102_v46 = vpack.c.bf16 %v40_v45, %v39_v44 }
 0x9b2   :  { %v672_v2 = vpack.c.bf16 %v671_v0, %v671_v0 }
 0x9b4   :  { %2680 = vmatmul.mubr.msk.bf16.vlgmr.msra.gmra.mrb[28].mxu1 %vm173_vm2, %v672_v2  ;;  %v2461_v2 = vld [vmem:[%s3535_s9 + $0x8] ss:$0 sm:$0xff] }
 0x9b5   :  { %v888_v5 = vpop.xlane.xlu0 %887  ;;  %2691 = vmatprep.mubr.msk.bf16.mxu1 %vm2978_vm0, %v2977_v1 }
 0x9b6   :  { %2905 = vrcp.f32 %v888_v5 }
 0x9b9   :  { %v893_v47 = vpop.permute.xlu0 %892 }
 0x9ba   :  { %v898_v22 = vsel %vm300_vm3, %v893_v47, 0 }
 0x9bb   :  { %2690 = vmatpush3.bf16.msra.mxu1 %v898_v22 }
 0x9bc   :  { %2701 = vmatprep.subr.bf16.mxu1 %v2977_v1 }
 0x9bd   :  { %v999_v3 = vpop.xlane.xlu1 %998 }
 0x9be   :  { %2907 = vrcp.f32 %v999_v3 }
 0x9c0   :  { %v2906_v6 = vpop.eup %2905 }
 0x9c1   :  { %v890_v7 = vmul.f32 %v2906_v6, %v2900_v54  ;;  %v1004_v8 = vpop.permute.xlu1 %1003  ;;  %v2466_v6 = vld [vmem:[%s3535_s9 + $0x3] ss:$0 sm:$0xff] }
 0x9c2   :  { %v1009_v10 = vsel %vm300_vm3, %v1004_v8, 0 }
 0x9c3   :  { %v891_v9 = vpack.c.bf16 %v890_v7, %v890_v7 }
 0x9c5   :  { %2692 = vmatmul.mubr.msk.bf16.vlgmr.msra.gmra.mrb[32].mxu1 %vm173_vm2, %v891_v9 }
 0x9c6   :  { %2702 = vmatpush3.bf16.msra.mxu1 %v1009_v10  ;;  %2703 = vmatprep.mubr.msk.bf16.mxu1 %vm2978_vm0, %v2977_v1 }
 0x9c7   :  { %2715 = vmatprep.subr.bf16.mxu1 %v2865_v43 }
 0x9c8   :  { %v2908_v11 = vpop.eup %2907 }
 0x9c9   :  { %v1001_v12 = vmul.f32 %v2908_v11, %v2902_v56 }
 0x9cb   :  { %v1002_v13 = vpack.c.bf16 %v1001_v12, %v1001_v12 }
 0x9cd   :  { %2704 = vmatmul.mubr.msk.bf16.vlgmr.msra.gmra.mrb[36].mxu1 %vm173_vm2, %v1002_v13 }
 0x9ce   :  { %2716 = vmatpush3.bf16.msra.mxu1 %v2865_v43  ;;  %2719 = vmatprep.mubr.msk.bf16.mxu1 %vm65_vm1, %v1102_v46 }
 0x9f2   :  { %v1064_v26 = vpop.xlane.xlu1 %1063 }
 0x9f3   :  { %v1069_v27 = vmul.f32 0.03125, %v1064_v26 }
 0x9f5   :  { %v1071_v33 = vsub.f32 %v1058_v60, %v1069_v27 }
 0x9f7   :  { %v1073_v37 = vmul.f32 %v1071_v33, %v1071_v33 }
 0x9f9   :  { %v1075_v15 = vsel %vm65_vm1, %v1073_v37, 0.0 }
 0xa87   :  { %v824_v14 = vpop.f32.mrb[28].mxu1 }
 0xa88   :  { %v825_v16 = vadd.f32 %v824_v14, %v3219_v29  ;;  %v2681_v17 = vpop.f32.mrb[29].mxu1 }
 0xa89   :  { %v827_v18 = vpop.f32.mrb[30].mxu1 }
 0xa8a   :  { %v2682_v19 = vpop.f32.mrb[31].mxu1 }
 0xa8b   :  { %v2869_v19 = vld [vmem:[%s3532_s6] sm:$0xff]  }
 0xa8c   :  { %2723 = vmatprep.subr.bf16.mxu0 %v2869_v19 }
 0xa98   :  { %v934_v20 = vpop.f32.mrb[32].mxu1 }
 0xa99   :  { %v940_v21 = vadd.f32 %v934_v20, %v825_v16  ;;  %v2693_v23 = vpop.f32.mrb[33].mxu1  ;;  %v2870_v20 = vld [vmem:[%s3532_s6 + $0x8] sm:$0xff]  }
 0xa9a   :  { %v937_v24 = vpop.f32.mrb[34].mxu1 }
 0xa9b   :  { %v2694_v25 = vpop.f32.mrb[35].mxu1  ;;  %v2462_v24 = vld [vmem:[%s3535_s9 + $0x2] ss:$0 sm:$0xff] }
 0xaa0   :  { %v1045_v28 = vpop.f32.mrb[36].mxu1 }
 0xaa1   :  { %v1051_v30 = vadd.f32 %v1045_v28, %v940_v21  ;;  %v2705_v31 = vpop.f32.mrb[37].mxu1 }
 0xaa2   :  { %v1048_v32 = vpop.f32.mrb[38].mxu1 }
 0xaa3   :  { %v1057_v34 = vadd.f32 %v2459_v58, %v1051_v30  ;;  %v2706_v35 = vpop.f32.mrb[39].mxu1 }
 0xaa5   :  { %v1059_v36 = vadd.f32 %v1057_v34, %v3064_v4  ;;  %v2866_v4 = vld [vmem:[%s3531_s5 + $0x8] sm:$0xff]  }
 0xaa6   :  { %2717 = vmatprep.subr.bf16.mxu1 %v2866_v4 }
 0xaa7   :  { %v1065_v29 = vsel %vm65_vm1, %v1059_v36, 0.0  ;;  %2718 = vmatpush3.bf16.msra.mxu1 %v2866_v4 }
 0xaa8   :  { %1066 = vadd.xlane.f32.xlu0 %v1065_v29  ;;  %2731 = vmatprep.subr.bf16.mxu1 %v2977_v1 }
 0xaaa   :  { %2720 = vmatmul.mubr.msk.bf16.vlgmr.msra.gmra.mrb[40].mxu1 %vm65_vm1, %v1103_v50 }
 0xaab   :  { %2733 = vmatprep.mubr.msk.bf16.mxu1 %vm2978_vm0, %v2977_v1 }
 0xaac   :  { %1076 = vadd.xlane.f32.xlu0 %v1075_v15 }
 0xb35   :  { %v1067_v38 = vpop.xlane.xlu0 %1066 }
 0xb36   :  { %v1070_v39 = vmul.f32 0.03125, %v1067_v38 }
 0xb38   :  { %v1072_v40 = vsub.f32 %v1059_v36, %v1070_v39 }
 0xb39   :  { %v1077_v53 = vpop.xlane.xlu0 %1076 }
 0xb3a   :  { %v1074_v41 = vmul.f32 %v1072_v40, %v1072_v40  ;;  %v1081_v54 = vmul.f32 0.03125, %v1077_v53 }
 0xb3c   :  { %v1078_v42 = vsel %vm65_vm1, %v1074_v41, 0.0  ;;  %v1083_v55 = vadd.f32 1e-05, %v1081_v54 }
 0xb3d   :  { %1079 = vadd.xlane.f32.xlu1 %v1078_v42 }
 0xb3e   :  { %2909 = vrsqrt.f32 %v1083_v55 }
 0xb48   :  { %v2910_v59 = vpop.eup %2909 }
 0xb49   :  { %v1087_v60 = vmul.f32 %v2910_v59, %v1071_v33 }
 0xb4b   :  { %v1093_v63 = vmul.f32 %v2460_v61, %v1087_v60 }
 0xb4d   :  { %v3287_v47 = vadd.f32 %v2461_v2, %v1093_v63 }
 0xb7d   :  { %v2721_v7 = vpop.f32.mrb[40].mxu1 }
 0xb7e   :  { %v1239_v8 = vadd.f32 %v2721_v7, %v2466_v6  ;;  %v1230_v9 = vpop.f32.mrb[41].mxu1 }
 0xb7f   :  { %v1231_v10 = vadd.f32 %v2466_v6, %v1230_v9  ;;  %v2722_v11 = vpop.f32.mrb[42].mxu1 }
 0xb80   :  { %v1242_v12 = vadd.f32 %v2722_v11, %v2466_v6  ;;  %v1233_v13 = vpop.f32.mrb[43].mxu1 }
 0xb81   :  { %v1234_v14 = vadd.f32 %v2466_v6, %v1233_v13 }
 0xb82   :  { %v3298_v16 = vpack.c.bf16 %v1242_v12, %v1239_v8 }
 0xb83   :  { %v1314_v17 = vpack.c.bf16 %v1234_v14, %v1231_v10 }
 0xb85   :  { %1379 = vrot.lane.b32.xlu0 %v1314_v17, %s2980_s25  ;;  %v1320_v18 = vsel %vm173_vm2, %v1314_v17, 0 }
 0xb86   :  { %2732 = vmatpush3.bf16.xpose.msra.mxu1 %v1320_v18 }
 0xb87   :  { %2743 = vmatprep.subr.bf16.mxu1 %v2977_v1 }
 0xbca   :  { %v1080_v56 = vpop.xlane.xlu1 %1079 }
 0xbcb   :  { %v1082_v57 = vmul.f32 0.03125, %v1080_v56 }
 0xbcd   :  { %v1084_v58 = vadd.f32 1e-05, %v1082_v57 }
 0xbcf   :  { %2911 = vrsqrt.f32 %v1084_v58 }
 0xbd9   :  { %v2912_v62 = vpop.eup %2911 }
 0xbda   :  { %v1088_v0 = vmul.f32 %v2912_v62, %v1072_v40 }
 0xbdc   :  { %v1094_v5 = vmul.f32 %v2460_v61, %v1088_v0  ;;  %v1752_v0 = vsel %vm173_vm2, %v3298_v16, 0 }
 0xbde   :  { %v3289_v22 = vadd.f32 %v2461_v2, %v1094_v5 }
 0xbe0   :  { %v1101_v3 = vpack.c.bf16 %v3289_v22, %v3287_v47 }
 0xbe2   :  { %2712 = vmatmul.mubr.msk.bf16.vlgmr.msra.gmra.mrb[32].mxu0 %vm65_vm1, %v1101_v3 }
 0xbe3   :  { %2727 = vmatprep.mubr.msk.bf16.mxu0 %vm65_vm1, %v1102_v46  ;;  %2724 = vmatpush3.bf16.msra.mxu0 %v2869_v19 }
 0xbe4   :  { %2725 = vmatprep.subr.bf16.mxu0 %v2870_v20 }
 0xbe7   :  { %2726 = vmatpush3.bf16.msra.mxu0 %v2870_v20 }
 0xbe8   :  { %2737 = vmatprep.subr.bf16.mxu0 %v2977_v1 }
 0xbea   :  { %2728 = vmatmul.mubr.msk.bf16.vlgmr.msra.gmra.mrb[36].mxu0 %vm65_vm1, %v1103_v50 }
 0xbeb   :  { %2739 = vmatprep.mubr.msk.bf16.mxu0 %vm2978_vm0, %v2977_v1 }
 0xbf7   :  { %v1380_v21 = vpop.permute.xlu0 %1379 }
 0xbf8   :  { %v1385_v23 = vsel %vm173_vm2, %v1380_v21, 0 }
 0xbf9   :  { %2738 = vmatpush3.bf16.xpose.msra.mxu0 %v1385_v23 }
 0xbfa   :  { %2749 = vmatprep.subr.bf16.mxu0 %v2977_v1 }
 0xcb5   :  { %v1162_v25 = vpop.f32.mrb[32].mxu0 }
 0xcb6   :  { %v2713_v26 = vpop.f32.mrb[33].mxu0  ;;  %v1163_v28 = vadd.f32 %v2462_v24, %v1162_v25 }
 0xcb7   :  { %v1165_v27 = vpop.f32.mrb[34].mxu0 }
 0xcb8   :  { %v1166_v30 = vadd.f32 %v2462_v24, %v1165_v27  ;;  %v2714_v31 = vpop.f32.mrb[35].mxu0 }
 0xcba   :  { %v3318_v32 = vpack.c.bf16 %v1166_v30, %v1163_v28 }
 0xcbc   :  { %1376 = vrot.lane.b32.xlu1 %v3318_v32, %s2980_s25  ;;  %2734 = vmatmul.mubr.msk.bf16.vlgmr.msra.gmra.mrb[44].mxu1 %vm173_vm2, %v3318_v32  ;;  %v3364_v2 = vrot.slane %v3318_v32, 4 }
 0xcbd   :  { %2745 = vmatprep.mubr.msk.bf16.mxu1 %vm2978_vm0, %v2977_v1  ;;  %v2729_v33 = vpop.f32.mrb[36].mxu0 }
 0xcbe   :  { %v1295_v34 = vpop.f32.mrb[37].mxu0 }
 0xcbf   :  { %v2730_v35 = vpop.f32.mrb[38].mxu0 }
 0xcc0   :  { %v3326_v36 = vpack.c.bf16 %v2730_v35, %v2729_v33  ;;  %v1298_v29 = vpop.f32.mrb[39].mxu0 }
 0xcc1   :  { %v3328_v37 = vpack.c.bf16 %v1298_v29, %v1295_v34 }
 0xd2e   :  { %v1377_v15 = vpop.permute.xlu1 %1376 }
 0xd2f   :  { %2740 = vmatmul.mubr.msk.bf16.vlgmr.msra.gmra.mrb[40].mxu0 %vm173_vm2, %v1377_v15 }
 0xd30   :  { %2750 = vmatpush3.bf16.msra.mxu0 %v3328_v37  ;;  %2751 = vmatprep.mubr.msk.bf16.mxu0 %vm2978_vm0, %v2977_v1 }
 0xd31   :  { %2761 = vmatprep.subr.bf16.mxu0 %v2977_v1 }
 0xd8f   :  { %v1356_v38 = vpop.f32.mrb[44].mxu1 }
 0xd90   :  { %v2735_v39 = vpop.f32.mrb[45].mxu1  ;;  %v1363_v52 = vsel %vm1362_vm4, %v1356_v38, -inf }
 0xd91   :  { %v1359_v40 = vpop.f32.mrb[46].mxu1 }
 0xd92   :  { %v2736_v41 = vpop.f32.mrb[47].mxu1 }
 0xe02   :  { %v1421_v42 = vpop.f32.mrb[40].mxu0 }
 0xe03   :  { %v2741_v43 = vpop.f32.mrb[41].mxu0  ;;  %v1427_v4 = vsel %vm1362_vm4, %v1421_v42, -inf }
 0xe04   :  { %1428 = vmax.xlane.f32.xlu1 %v1427_v4  ;;  %v1424_v44 = vpop.f32.mrb[42].mxu0 }
 0xe05   :  { %v2742_v45 = vpop.f32.mrb[43].mxu0 }
 0xe15   :  { %1531 = vrot.lane.b32.xlu1 %v1314_v17, %s2983_s28 }
 0xe19   :  { %1529 = vrot.lane.b32.xlu1 %v3318_v32, %s2983_s28 }
 0xe1d   :  { %1638 = vrot.lane.b32.xlu1 %v3318_v32, %s2985_s30 }
 0xe91   :  { %v1429_v46 = vpop.xlane.xlu1 %1428 }
 0xe92   :  { %v1430_v48 = vsub.f32 %v1421_v42, %v1429_v46 }
 0xe94   :  { %v1431_v49 = vmul.f32 1.442695, %v1430_v48 }
 0xe95   :  { %v1532_v57 = vpop.permute.xlu1 %1531 }
 0xe96   :  { %2913 = vpow2.f32 %v1431_v49  ;;  %v1537_v59 = vsel %vm173_vm2, %v1532_v57, 0 }
 0xe99   :  { %v1530_v61 = vpop.permute.xlu1 %1529 }
 0xe9d   :  { %v1639_v63 = vpop.permute.xlu1 %1638 }
 0xea0   :  { %v2914_v50 = vpop.eup %2913 }
 0xea1   :  { %v1433_v51 = vsel %vm1362_vm4, %v2914_v50, 0.0 }
 0xea2   :  { %1434 = vadd.xlane.f32.xlu0 %v1433_v51 }
 0xeb8   :  { %1440 = vrot.lane.b32.xlu0 %v3328_v37, %s2981_s26 }
 0xebc   :  { %1640 = vrot.lane.b32.xlu0 %v1314_v17, %s2985_s30 }
 0xedb   :  { %1364 = vmax.xlane.f32.xlu0 %v1363_v52 }
 0xf2f   :  { %v1435_v53 = vpop.xlane.xlu0 %1434 }
 0xf30   :  { %2915 = vrcp.f32 %v1435_v53 }
 0xf33   :  { %v1441_v54 = vpop.permute.xlu0 %1440 }
 0xf34   :  { %2744 = vmatpush3.bf16.msra.mxu1 %v1441_v54 }
 0xf35   :  { %2755 = vmatprep.subr.bf16.mxu1 %v2977_v1 }
 0xf37   :  { %v1641_v60 = vpop.permute.xlu0 %1640 }
 0xf38   :  { %v1646_v62 = vsel %vm173_vm2, %v1641_v60, 0 }
 0xf3a   :  { %v2916_v55 = vpop.eup %2915 }
 0xf3b   :  { %v1437_v56 = vmul.f32 %v2916_v55, %v2914_v50 }
 0xf3d   :  { %v1438_v58 = vpack.c.bf16 %v1437_v56, %v1437_v56 }
 0xf3f   :  { %2746 = vmatmul.mubr.msk.bf16.vlgmr.msra.gmra.mrb[48].mxu1 %vm1362_vm4, %v1438_v58 }
 0xf40   :  { %2756 = vmatpush3.bf16.xpose.msra.mxu1 %v1537_v59  ;;  %2757 = vmatprep.mubr.msk.bf16.mxu1 %vm2978_vm0, %v2977_v1 }
 0xf41   :  { %2767 = vmatprep.subr.bf16.mxu1 %v2977_v1 }
 0xf47   :  { %2758 = vmatmul.mubr.msk.bf16.vlgmr.msra.gmra.mrb[52].mxu1 %vm173_vm2, %v1530_v61 }
 0xf48   :  { %2768 = vmatpush3.bf16.xpose.msra.mxu1 %v1646_v62  ;;  %2769 = vmatprep.mubr.msk.bf16.mxu1 %vm2978_vm0, %v2977_v1 }
 0xf49   :  { %2779 = vmatprep.subr.bf16.mxu1 %v2977_v1 }
 0xf4f   :  { %2770 = vmatmul.mubr.msk.bf16.vlgmr.msra.gmra.mrb[56].mxu1 %vm173_vm2, %v1639_v63 }
 0xf50   :  { %2780 = vmatpush3.bf16.xpose.msra.mxu1 %v1752_v0  ;;  %2781 = vmatprep.mubr.msk.bf16.mxu1 %vm2978_vm0, %v2977_v1 }
 0xf51   :  { %2791 = vmatprep.subr.bf16.mxu1 %v2977_v1 }
 0xf57   :  { %2782 = vmatmul.mubr.msk.bf16.vlgmr.msra.gmra.mrb[60].mxu1 %vm173_vm2, %v3364_v2 }
 0xf58   :  { %2793 = vmatprep.mubr.msk.bf16.mxu1 %vm2978_vm0, %v2977_v1 }
 0xf68   :  { %v1365_v5 = vpop.xlane.xlu0 %1364 }
 0xf69   :  { %v1366_v3 = vsub.f32 %v1356_v38, %v1365_v5 }
 0xf6b   :  { %v1367_v10 = vmul.f32 1.442695, %v1366_v3 }
 0xf6d   :  { %2917 = vpow2.f32 %v1367_v10 }
 0xf77   :  { %v2918_v21 = vpop.eup %2917 }
 0xf78   :  { %v1369_v25 = vsel %vm1362_vm4, %v2918_v21, 0.0 }
0x1012   :  { %v3370_v6 = vpop.f32.mrb[48].mxu1 }
0x1013   :  { %v2747_v7 = vpop.f32.mrb[49].mxu1 }
0x1014   :  { %v1483_v8 = vpop.f32.mrb[50].mxu1 }
0x1015   :  { %v2748_v9 = vpop.f32.mrb[51].mxu1 }
0x101a   :  { %v1573_v11 = vpop.f32.mrb[52].mxu1 }
0x101b   :  { %v2759_v12 = vpop.f32.mrb[53].mxu1  ;;  %v1579_v13 = vsel %vm1362_vm4, %v1573_v11, -inf }
0x101c   :  { %1580 = vmax.xlane.f32.xlu1 %v1579_v13  ;;  %v1576_v14 = vpop.f32.mrb[54].mxu1 }
0x101d   :  { %v2760_v17 = vpop.f32.mrb[55].mxu1 }
0x1022   :  { %v1682_v18 = vpop.f32.mrb[56].mxu1 }
0x1023   :  { %v2771_v19 = vpop.f32.mrb[57].mxu1  ;;  %v1688_v20 = vsel %vm1362_vm4, %v1682_v18, -inf }
0x1024   :  { %1689 = vmax.xlane.f32.xlu0 %v1688_v20  ;;  %v1685_v23 = vpop.f32.mrb[58].mxu1 }
0x1025   :  { %v2772_v24 = vpop.f32.mrb[59].mxu1 }
0x1028   :  { %1370 = vadd.xlane.f32.xlu0 %v1369_v25 }
0x102a   :  { %v3375_v26 = vpop.f32.mrb[60].mxu1 }
0x102b   :  { %v2783_v27 = vpop.f32.mrb[61].mxu1 }
0x102c   :  { %v1791_v28 = vpop.f32.mrb[62].mxu1 }
0x102d   :  { %v2784_v30 = vpop.f32.mrb[63].mxu1 }
0x10a9   :  { %v1581_v31 = vpop.xlane.xlu1 %1580 }
0x10aa   :  { %v1582_v32 = vsub.f32 %v1573_v11, %v1581_v31 }
0x10ac   :  { %v1583_v33 = vmul.f32 1.442695, %v1582_v32 }
0x10ae   :  { %2919 = vpow2.f32 %v1583_v33 }
0x10b1   :  { %v1690_v34 = vpop.xlane.xlu0 %1689 }
0x10b2   :  { %v1691_v35 = vsub.f32 %v1682_v18, %v1690_v34 }
0x10b4   :  { %v1692_v29 = vmul.f32 1.442695, %v1691_v35 }
0x10b5   :  { %v1371_v15 = vpop.xlane.xlu0 %1370 }
0x10b6   :  { %2921 = vpow2.f32 %v1692_v29 }
0x10b7   :  { %2923 = vrcp.f32 %v1371_v15 }
0x10b8   :  { %v2920_v38 = vpop.eup %2919 }
0x10b9   :  { %v1585_v39 = vsel %vm1362_vm4, %v2920_v38, 0.0 }
0x10ba   :  { %1586 = vadd.xlane.f32.xlu1 %v1585_v39 }
0x10c0   :  { %v2922_v40 = vpop.eup %2921 }
0x10c1   :  { %v2924_v41 = vpop.eup %2923  ;;  %v1694_v42 = vsel %vm1362_vm4, %v2922_v40, 0.0 }
0x10c2   :  { %v1373_v43 = vmul.f32 %v2924_v41, %v2918_v21  ;;  %1695 = vadd.xlane.f32.xlu0 %v1694_v42 }
0x10c4   :  { %v1374_v4 = vpack.c.bf16 %v1373_v43, %v1373_v43 }
0x10c6   :  { %2752 = vmatmul.mubr.msk.bf16.vlgmr.msra.gmra.mrb[44].mxu0 %vm1362_vm4, %v1374_v4 }
0x10c7   :  { %2763 = vmatprep.mubr.msk.bf16.mxu0 %vm2978_vm0, %v2977_v1 }
0x10cb   :  { %1591 = vrot.lane.b32.xlu1 %v3328_v37, %s2987_s12 }
0x10cf   :  { %1809 = vrot.lane.b32.xlu1 %v3298_v16, %s2980_s25 }
0x10d3   :  { %1806 = vrot.lane.b32.xlu1 %v3364_v2, %s2980_s25 }
0x10d8   :  { %1700 = vrot.lane.b32.xlu0 %v3328_v37, %s2986_s11 }
0x1147   :  { %v1587_v44 = vpop.xlane.xlu1 %1586 }
0x1148   :  { %2925 = vrcp.f32 %v1587_v44 }
0x114b   :  { %v1592_v45 = vpop.permute.xlu1 %1591 }
0x114c   :  { %2762 = vmatpush3.bf16.msra.mxu0 %v1592_v45 }
0x114d   :  { %2773 = vmatprep.subr.bf16.mxu0 %v2977_v1 }
0x114f   :  { %v1696_v46 = vpop.xlane.xlu0 %1695  ;;  %v1810_v53 = vpop.permute.xlu1 %1809 }
0x1150   :  { %2927 = vrcp.f32 %v1696_v46  ;;  %v1815_v55 = vsel %vm173_vm2, %v1810_v53, 0 }
0x1152   :  { %v2926_v48 = vpop.eup %2925 }
0x1153   :  { %v1589_v49 = vmul.f32 %v2926_v48, %v2920_v38  ;;  %v1701_v51 = vpop.permute.xlu0 %1700  ;;  %v1807_v56 = vpop.permute.xlu1 %1806 }
0x1155   :  { %v1590_v50 = vpack.c.bf16 %v1589_v49, %v1589_v49 }
0x1157   :  { %2764 = vmatmul.mubr.msk.bf16.vlgmr.msra.gmra.mrb[48].mxu0 %vm1362_vm4, %v1590_v50 }
0x1158   :  { %2774 = vmatpush3.bf16.msra.mxu0 %v1701_v51  ;;  %2775 = vmatprep.mubr.msk.bf16.mxu0 %vm2978_vm0, %v2977_v1 }
0x1159   :  { %2785 = vmatprep.subr.bf16.mxu0 %v2977_v1 }
0x115a   :  { %v2928_v37 = vpop.eup %2927 }
0x115b   :  { %v1698_v52 = vmul.f32 %v2928_v37, %v2922_v40 }
0x115d   :  { %v1699_v54 = vpack.c.bf16 %v1698_v52, %v1698_v52 }
0x115f   :  { %2776 = vmatmul.mubr.msk.bf16.vlgmr.msra.gmra.mrb[52].mxu0 %vm1362_vm4, %v1699_v54 }
0x1160   :  { %2787 = vmatprep.mubr.msk.bf16.mxu0 %vm2978_vm0, %v2977_v1 }
0x1161   :  { %2786 = vmatpush3.bf16.xpose.msra.mxu0 %v1815_v55 }
0x1162   :  { %2797 = vmatprep.subr.bf16.mxu0 %v2977_v1 }
0x1168   :  { %2788 = vmatmul.mubr.msk.bf16.vlgmr.msra.gmra.mrb[56].mxu0 %vm173_vm2, %v1807_v56 }
0x1169   :  { %2798 = vmatpush3.bf16.msra.mxu0 %v3326_v36  ;;  %2799 = vmatprep.mubr.msk.bf16.mxu0 %vm2978_vm0, %v2977_v1 }
0x116a   :  { %2809 = vmatprep.subr.bf16.mxu0 %v2977_v1 }
0x1199   :  { %v1523_v57 = vpop.f32.mrb[44].mxu0 }
0x119a   :  { %v1524_v58 = vadd.f32 %v1523_v57, %v3370_v6  ;;  %v2753_v59 = vpop.f32.mrb[45].mxu0 }
0x119b   :  { %v1526_v60 = vpop.f32.mrb[46].mxu0 }
0x119c   :  { %v2754_v61 = vpop.f32.mrb[47].mxu0 }
0x122a   :  { %v1631_v62 = vpop.f32.mrb[48].mxu0 }
0x122b   :  { %v1637_v63 = vadd.f32 %v1631_v62, %v1524_v58  ;;  %v2765_v0 = vpop.f32.mrb[49].mxu0 }
0x122c   :  { %v1634_v5 = vpop.f32.mrb[50].mxu0 }
0x122d   :  { %v2766_v3 = vpop.f32.mrb[51].mxu0 }
0x1232   :  { %v1740_v7 = vpop.f32.mrb[52].mxu0 }
0x1233   :  { %v3406_v8 = vadd.f32 %v1740_v7, %v1637_v63  ;;  %v2777_v9 = vpop.f32.mrb[53].mxu0 }
0x1234   :  { %v1743_v10 = vpop.f32.mrb[54].mxu0 }
0x1235   :  { %v2778_v11 = vpop.f32.mrb[55].mxu0 }
0x1236   :  { %v2491_v11 = vld [vmem:[%s3535_s9 + $0x4] ss:$0 sm:$0xff] }
0x123b   :  { %v1851_v12 = vpop.f32.mrb[56].mxu0 }
0x123c   :  { %v2789_v13 = vpop.f32.mrb[57].mxu0  ;;  %v1857_v14 = vsel %vm1362_vm4, %v1851_v12, -inf }
0x123d   :  { %1858 = vmax.xlane.f32.xlu0 %v1857_v14  ;;  %v1854_v6 = vpop.f32.mrb[58].mxu0  ;;  %v2181_v14 = vadd.f32 %v2491_v11, %v3406_v8 }
0x123e   :  { %v2790_v17 = vpop.f32.mrb[59].mxu0 }
0x123f   :  { %v2183_v6 = vadd.f32 %v2181_v14, %v3287_v47 }
0x1241   :  { %v2187_v17 = vsel %vm65_vm1, %v2183_v6, 0.0 }
0x1253   :  { %1870 = vrot.lane.b32.xlu0 %v3326_v36, %s2981_s26 }
0x1257   :  { %1959 = vrot.lane.b32.xlu0 %v3364_v2, %s2983_s28 }
0x125b   :  { %2068 = vrot.lane.b32.xlu0 %v3364_v2, %s2985_s30  ;;  %v1794_v2 = vsel %vm1362_vm4, %v3375_v26, -inf }
0x12ca   :  { %v1859_v18 = vpop.xlane.xlu0 %1858 }
0x12cb   :  { %v1860_v19 = vsub.f32 %v1851_v12, %v1859_v18 }
0x12cd   :  { %v1861_v20 = vmul.f32 1.442695, %v1860_v19 }
0x12ce   :  { %v1871_v21 = vpop.permute.xlu0 %1870 }
0x12cf   :  { %2929 = vpow2.f32 %v1861_v20  ;;  %2792 = vmatpush3.bf16.msra.mxu1 %v1871_v21 }
0x12d0   :  { %2803 = vmatprep.subr.bf16.mxu1 %v2977_v1 }
0x12d2   :  { %v1960_v33 = vpop.permute.xlu0 %1959 }
0x12d6   :  { %v2069_v35 = vpop.permute.xlu0 %2068 }
0x12d9   :  { %v2930_v23 = vpop.eup %2929 }
0x12da   :  { %v1863_v24 = vsel %vm1362_vm4, %v2930_v23, 0.0 }
0x12db   :  { %1864 = vadd.xlane.f32.xlu1 %v1863_v24 }
0x12ec   :  { %1961 = vrot.lane.b32.xlu1 %v3298_v16, %s2983_s28 }
0x12f0   :  { %2070 = vrot.lane.b32.xlu1 %v3298_v16, %s2985_s30 }
0x1314   :  { %1795 = vmax.xlane.f32.xlu1 %v1794_v2 }
0x1368   :  { %v1865_v25 = vpop.xlane.xlu1 %1864 }
0x1369   :  { %2931 = vrcp.f32 %v1865_v25 }
0x136c   :  { %v1962_v30 = vpop.permute.xlu1 %1961 }
0x136d   :  { %v1967_v32 = vsel %vm173_vm2, %v1962_v30, 0 }
0x1370   :  { %v2071_v16 = vpop.permute.xlu1 %2070 }
0x1371   :  { %v2076_v34 = vsel %vm173_vm2, %v2071_v16, 0 }
0x1373   :  { %v2932_v27 = vpop.eup %2931 }
0x1374   :  { %v1867_v28 = vmul.f32 %v2932_v27, %v2930_v23 }
0x1376   :  { %v1868_v31 = vpack.c.bf16 %v1867_v28, %v1867_v28 }
0x1378   :  { %2794 = vmatmul.mubr.msk.bf16.vlgmr.msra.gmra.mrb[64].mxu1 %vm1362_vm4, %v1868_v31 }
0x1379   :  { %2804 = vmatpush3.bf16.xpose.msra.mxu1 %v1967_v32  ;;  %2805 = vmatprep.mubr.msk.bf16.mxu1 %vm2978_vm0, %v2977_v1 }
0x137a   :  { %2815 = vmatprep.subr.bf16.mxu1 %v2977_v1 }
0x1380   :  { %2806 = vmatmul.mubr.msk.bf16.vlgmr.msra.gmra.mrb[68].mxu1 %vm173_vm2, %v1960_v33 }
0x1381   :  { %2816 = vmatpush3.bf16.xpose.msra.mxu1 %v2076_v34  ;;  %2817 = vmatprep.mubr.msk.bf16.mxu1 %vm2978_vm0, %v2977_v1 }
0x1382   :  { %2827 = vmatprep.subr.bf16.mxu1 %v2977_v1 }
0x1388   :  { %2818 = vmatmul.mubr.msk.bf16.vlgmr.msra.gmra.mrb[72].mxu1 %vm173_vm2, %v2069_v35 }
0x1389   :  { %2831 = vmatprep.mubr.msk.bf16.mxu1 %vm2978_vm0, %v2977_v1 }
0x13a1   :  { %v1796_v29 = vpop.xlane.xlu1 %1795 }
0x13a2   :  { %v1797_v15 = vsub.f32 %v3375_v26, %v1796_v29 }
0x13a4   :  { %v1798_v38 = vmul.f32 1.442695, %v1797_v15 }
0x13a6   :  { %2933 = vpow2.f32 %v1798_v38 }
0x13b0   :  { %v2934_v39 = vpop.eup %2933 }
0x13b1   :  { %v1800_v40 = vsel %vm1362_vm4, %v2934_v39, 0.0 }
0x13b2   :  { %1801 = vadd.xlane.f32.xlu1 %v1800_v40 }
0x143f   :  { %v1802_v41 = vpop.xlane.xlu1 %1801 }
0x1440   :  { %2935 = vrcp.f32 %v1802_v41 }
0x144a   :  { %v2936_v42 = vpop.eup %2935 }
0x144b   :  { %v1804_v43 = vmul.f32 %v2936_v42, %v2934_v39  ;;  %v1910_v4 = vpop.f32.mrb[64].mxu1 }
0x144c   :  { %v2795_v44 = vpop.f32.mrb[65].mxu1 }
0x144d   :  { %v1913_v45 = vpop.f32.mrb[66].mxu1  ;;  %v1805_v46 = vpack.c.bf16 %v1804_v43, %v1804_v43 }
0x144e   :  { %v2796_v48 = vpop.f32.mrb[67].mxu1 }
0x144f   :  { %2800 = vmatmul.mubr.msk.bf16.vlgmr.msra.gmra.mrb[60].mxu0 %vm1362_vm4, %v1805_v46 }
0x1450   :  { %2811 = vmatprep.mubr.msk.bf16.mxu0 %vm2978_vm0, %v2977_v1 }
0x1453   :  { %v2003_v26 = vpop.f32.mrb[68].mxu1 }
0x1454   :  { %v2807_v49 = vpop.f32.mrb[69].mxu1  ;;  %v2009_v50 = vsel %vm1362_vm4, %v2003_v26, -inf }
0x1455   :  { %2010 = vmax.xlane.f32.xlu0 %v2009_v50  ;;  %v2006_v51 = vpop.f32.mrb[70].mxu1  ;;  %v2873_v49 = vld [vmem:[%s3534_s8] sm:$0xff]   ;;  %v2874_v50 = vld [vmem:[%s3534_s8 + $0x8] sm:$0xff]  }
0x1456   :  { %v2808_v37 = vpop.f32.mrb[71].mxu1 }
0x145b   :  { %v2112_v52 = vpop.f32.mrb[72].mxu1 }
0x145c   :  { %v2819_v53 = vpop.f32.mrb[73].mxu1  ;;  %v2118_v54 = vsel %vm1362_vm4, %v2112_v52, -inf }
0x145d   :  { %2119 = vmax.xlane.f32.xlu0 %v2118_v54  ;;  %v2115_v55 = vpop.f32.mrb[74].mxu1 }
0x145e   :  { %v2820_v56 = vpop.f32.mrb[75].mxu1 }
0x14e2   :  { %v2011_v57 = vpop.xlane.xlu0 %2010 }
0x14e3   :  { %v2012_v58 = vsub.f32 %v2003_v26, %v2011_v57  ;;  %v2871_v26 = vld [vmem:[%s3533_s7] sm:$0xff]  }
0x14e4   :  { %2828 = vmatpush3.bf16.msra.mxu1 %v2871_v26  ;;  %v2505_v26 = vld [vmem:[%s3535_s9 + $0xc] ss:$0 sm:$0xff] }
0x14e5   :  { %v2013_v59 = vmul.f32 1.442695, %v2012_v58  ;;  %2829 = vmatprep.subr.bf16.mxu1 %v2977_v1  ;;  %v2492_v58 = vld [vmem:[%s3535_s9 + $0x9] ss:$0 sm:$0xff] }
0x14e7   :  { %2937 = vpow2.f32 %v2013_v59 }
0x14ea   :  { %v2120_v60 = vpop.xlane.xlu0 %2119 }
0x14eb   :  { %v2121_v61 = vsub.f32 %v2112_v52, %v2120_v60 }
0x14ed   :  { %v2122_v62 = vmul.f32 1.442695, %v2121_v61 }
0x14ef   :  { %2939 = vpow2.f32 %v2122_v62  ;;  %v2493_v62 = vld [vmem:[%s3535_s9 + $0xa] ss:$0 sm:$0xff] }
0x14f1   :  { %v2938_v63 = vpop.eup %2937 }
0x14f2   :  { %v2015_v0 = vsel %vm1362_vm4, %v2938_v63, 0.0 }
0x14f3   :  { %2016 = vadd.xlane.f32.xlu0 %v2015_v0 }
0x14f9   :  { %v2940_v5 = vpop.eup %2939 }
0x14fa   :  { %v2124_v3 = vsel %vm1362_vm4, %v2940_v5, 0.0 }
0x14fb   :  { %2125 = vadd.xlane.f32.xlu1 %v2124_v3 }
0x1509   :  { %2021 = vrot.lane.b32.xlu0 %v3326_v36, %s2987_s12 }
0x150c   :  { %2130 = vrot.lane.b32.xlu1 %v3326_v36, %s2986_s11 }
0x1522   :  { %v1953_v7 = vpop.f32.mrb[60].mxu0 }
0x1523   :  { %v1954_v9 = vadd.f32 %v1953_v7, %v1910_v4  ;;  %v2801_v10 = vpop.f32.mrb[61].mxu0  ;;  %v2875_v7 = vld [vmem:[%s3534_s8 + $0x10] sm:$0xff]  }
0x1524   :  { %v1956_v12 = vpop.f32.mrb[62].mxu0  ;;  %v2494_v10 = vld [vmem:[%s3535_s9 + $0x5] ss:$0 sm:$0xff] }
0x1525   :  { %v2802_v13 = vpop.f32.mrb[63].mxu0 }
0x1530   :  { %2188 = vadd.xlane.f32.xlu1 %v2187_v17 }
0x1580   :  { %v2017_v18 = vpop.xlane.xlu0 %2016 }
0x1581   :  { %2941 = vrcp.f32 %v2017_v18 }
0x1584   :  { %v2022_v19 = vpop.permute.xlu0 %2021 }
0x1585   :  { %2810 = vmatpush3.bf16.msra.mxu0 %v2022_v19 }
0x1586   :  { %2821 = vmatprep.subr.bf16.mxu0 %v2977_v1 }
0x1588   :  { %v2126_v36 = vpop.xlane.xlu1 %2125 }
0x1589   :  { %2943 = vrcp.f32 %v2126_v36 }
0x158b   :  { %v2942_v20 = vpop.eup %2941 }
0x158c   :  { %v2019_v21 = vmul.f32 %v2942_v20, %v2938_v63  ;;  %v2131_v24 = vpop.permute.xlu1 %2130 }
0x158e   :  { %v2020_v23 = vpack.c.bf16 %v2019_v21, %v2019_v21 }
0x1590   :  { %2812 = vmatmul.mubr.msk.bf16.vlgmr.msra.gmra.mrb[64].mxu0 %vm1362_vm4, %v2020_v23 }
0x1591   :  { %2822 = vmatpush3.bf16.msra.mxu0 %v2131_v24  ;;  %2823 = vmatprep.mubr.msk.bf16.mxu0 %vm2978_vm0, %v2977_v1 }
0x1592   :  { %2835 = vmatprep.subr.bf16.mxu0 %v2977_v1 }
0x1593   :  { %v2944_v47 = vpop.eup %2943 }
0x1594   :  { %v2128_v8 = vmul.f32 %v2944_v47, %v2940_v5 }
0x1596   :  { %v2129_v2 = vpack.c.bf16 %v2128_v8, %v2128_v8 }
0x1598   :  { %2824 = vmatmul.mubr.msk.bf16.vlgmr.msra.gmra.mrb[68].mxu0 %vm1362_vm4, %v2129_v2 }
0x1599   :  { %2843 = vmatprep.mubr.msk.bf16.mxu0 %vm2978_vm0, %v2977_v1  ;;  %2836 = vmatpush3.bf16.msra.mxu0 %v2873_v49 }
0x159a   :  { %2837 = vmatprep.subr.bf16.mxu0 %v2977_v1 }
0x159d   :  { %2838 = vmatpush3.bf16.msra.mxu0 %v2874_v50 }
0x159e   :  { %2839 = vmatprep.subr.bf16.mxu0 %v2977_v1 }
0x15a1   :  { %2840 = vmatpush3.bf16.msra.mxu0 %v2875_v7 }
0x15a2   :  { %2841 = vmatprep.subr.bf16.mxu0 %v2977_v1  ;;  %v2498_v1 = vld [vmem:[%s3535_s9 + $0x6] ss:$0 sm:$0xff] }
0x15bd   :  { %v2189_v32 = vpop.xlane.xlu1 %2188 }
0x15be   :  { %v2193_v16 = vmul.f32 0.03125, %v2189_v32 }
0x15c0   :  { %v2195_v15 = vsub.f32 %v2183_v6, %v2193_v16 }
0x15c2   :  { %v2197_v42 = vmul.f32 %v2195_v15, %v2195_v15 }
0x15c4   :  { %v2199_v43 = vsel %vm65_vm1, %v2197_v42, 0.0 }
0x1663   :  { %v2061_v25 = vpop.f32.mrb[64].mxu0 }
0x1664   :  { %v2067_v27 = vadd.f32 %v2061_v25, %v1954_v9  ;;  %v2813_v28 = vpop.f32.mrb[65].mxu0  ;;  %v2876_v9 = vld [vmem:[%s3534_s8 + $0x18] sm:$0xff]  }
0x1665   :  { %v2064_v30 = vpop.f32.mrb[66].mxu0  ;;  %2842 = vmatpush3.bf16.msra.mxu0 %v2876_v9 }
0x1666   :  { %v2814_v31 = vpop.f32.mrb[67].mxu0 }
0x166b   :  { %v2170_v33 = vpop.f32.mrb[68].mxu0 }
0x166c   :  { %v2176_v34 = vadd.f32 %v2170_v33, %v2067_v27  ;;  %v2825_v35 = vpop.f32.mrb[69].mxu0 }
0x166d   :  { %v2173_v29 = vpop.f32.mrb[70].mxu0 }
0x166e   :  { %v2182_v38 = vadd.f32 %v2491_v11, %v2176_v34  ;;  %v2826_v39 = vpop.f32.mrb[71].mxu0 }
0x1670   :  { %v2184_v40 = vadd.f32 %v2182_v38, %v3289_v22  ;;  %v2872_v22 = vld [vmem:[%s3533_s7 + $0x8] sm:$0xff]  }
0x1671   :  { %2830 = vmatpush3.bf16.msra.mxu1 %v2872_v22 }
0x1672   :  { %v2190_v41 = vsel %vm65_vm1, %v2184_v40, 0.0 }
0x1673   :  { %2191 = vadd.xlane.f32.xlu0 %v2190_v41 }
0x1677   :  { %2200 = vadd.xlane.f32.xlu0 %v2199_v43 }
0x1700   :  { %v2192_v4 = vpop.xlane.xlu0 %2191 }
0x1701   :  { %v2194_v44 = vmul.f32 0.03125, %v2192_v4 }
0x1703   :  { %v2196_v45 = vsub.f32 %v2184_v40, %v2194_v44 }
0x1704   :  { %v2201_v51 = vpop.xlane.xlu0 %2200 }
0x1705   :  { %v2198_v46 = vmul.f32 %v2196_v45, %v2196_v45  ;;  %v2205_v37 = vmul.f32 0.03125, %v2201_v51 }
0x1707   :  { %v2202_v48 = vsel %vm65_vm1, %v2198_v46, 0.0  ;;  %v2207_v52 = vadd.f32 1e-05, %v2205_v37 }
0x1708   :  { %2203 = vadd.xlane.f32.xlu1 %v2202_v48 }
0x1709   :  { %2945 = vrsqrt.f32 %v2207_v52 }
0x1713   :  { %v2946_v56 = vpop.eup %2945 }
0x1714   :  { %v2211_v57 = vmul.f32 %v2946_v56, %v2195_v15 }
0x1716   :  { %v2217_v60 = vmul.f32 %v2492_v58, %v2211_v57 }
0x1718   :  { %v2223_v0 = vadd.f32 %v2493_v62, %v2217_v60 }
0x1795   :  { %v2204_v53 = vpop.xlane.xlu1 %2203 }
0x1796   :  { %v2206_v54 = vmul.f32 0.03125, %v2204_v53 }
0x1798   :  { %v2208_v55 = vadd.f32 1e-05, %v2206_v54 }
0x179a   :  { %2947 = vrsqrt.f32 %v2208_v55 }
0x17a4   :  { %v2948_v59 = vpop.eup %2947 }
0x17a5   :  { %v2212_v61 = vmul.f32 %v2948_v59, %v2196_v45  ;;  %v2504_v45 = vld [vmem:[%s3535_s9 + $0xb] ss:$0 sm:$0xff] }
0x17a7   :  { %v2218_v63 = vmul.f32 %v2492_v58, %v2212_v61 }
0x17a9   :  { %v2224_v5 = vadd.f32 %v2493_v62, %v2218_v63 }
0x17ab   :  { %v2225_v3 = vpack.c.bf16 %v2224_v5, %v2223_v0 }
0x17ad   :  { %2832 = vmatmul.mubr.msk.bf16.vlgmr.msra.gmra.mrb[76].mxu1 %vm65_vm1, %v2225_v3 }
0x1880   :  { %v2284_v11 = vpop.f32.mrb[76].mxu1 }
0x1881   :  { %v2285_v12 = vadd.f32 %v2494_v10, %v2284_v11  ;;  %v2833_v13 = vpop.f32.mrb[77].mxu1 }
0x1882   :  { %v2287_v14 = vpop.f32.mrb[78].mxu1 }
0x1883   :  { %v2288_v6 = vadd.f32 %v2494_v10, %v2287_v14  ;;  %v2834_v17 = vpop.f32.mrb[79].mxu1  ;;  %v2291_v18 = vmax.f32 %v2285_v12, 0.0 }
0x1885   :  { %v2292_v19 = vmax.f32 %v2288_v6, 0.0 }
0x1887   :  { %v2293_v36 = vpack.c.bf16 %v2292_v19, %v2291_v18 }
0x1889   :  { %2844 = vmatmul.mubr.msk.bf16.vlgmr.msra.gmra.mrb[72].mxu0 %vm2331_vm5, %v2293_v36 }
0x195c   :  { %v2369_v20 = vpop.f32.mrb[72].mxu0 }
0x195d   :  { %v2370_v21 = vadd.f32 %v2498_v1, %v2369_v20  ;;  %v2845_v23 = vpop.f32.mrb[73].mxu0 }
0x195e   :  { %v2372_v24 = vpop.f32.mrb[74].mxu0 }
0x195f   :  { %v2373_v47 = vadd.f32 %v2498_v1, %v2372_v24  ;;  %v2846_v8 = vpop.f32.mrb[75].mxu0  ;;  %v2376_v2 = vadd.f32 %v2370_v21, %v2223_v0 }
0x1961   :  { %v2380_v25 = vsel %vm65_vm1, %v2376_v2, 0.0  ;;  %v2377_v27 = vadd.f32 %v2373_v47, %v2224_v5 }
0x1962   :  { %2381 = vadd.xlane.f32.xlu0 %v2380_v25 }
0x1963   :  { %v2383_v28 = vsel %vm65_vm1, %v2377_v27, 0.0 }
0x1964   :  { %2384 = vadd.xlane.f32.xlu1 %v2383_v28 }
0x19ef   :  { %v2382_v30 = vpop.xlane.xlu0 %2381 }
0x19f0   :  { %v2386_v31 = vmul.f32 0.03125, %v2382_v30 }
0x19f1   :  { %v2385_v32 = vpop.xlane.xlu1 %2384 }
0x19f2   :  { %v2388_v16 = vsub.f32 %v2376_v2, %v2386_v31  ;;  %v2387_v33 = vmul.f32 0.03125, %v2385_v32 }
0x19f4   :  { %v2389_v34 = vsub.f32 %v2377_v27, %v2387_v33  ;;  %v2390_v35 = vmul.f32 %v2388_v16, %v2388_v16 }
0x19f6   :  { %v2392_v29 = vsel %vm65_vm1, %v2390_v35, 0.0  ;;  %v2391_v15 = vmul.f32 %v2389_v34, %v2389_v34 }
0x19f7   :  { %2393 = vadd.xlane.f32.xlu0 %v2392_v29 }
0x19f8   :  { %v2395_v38 = vsel %vm65_vm1, %v2391_v15, 0.0 }
0x19f9   :  { %2396 = vadd.xlane.f32.xlu1 %v2395_v38 }
0x1a84   :  { %v2394_v39 = vpop.xlane.xlu0 %2393 }
0x1a85   :  { %v2398_v40 = vmul.f32 0.03125, %v2394_v39 }
0x1a86   :  { %v2397_v41 = vpop.xlane.xlu1 %2396 }
0x1a87   :  { %v2400_v42 = vadd.f32 1e-05, %v2398_v40  ;;  %v2399_v43 = vmul.f32 0.03125, %v2397_v41 }
0x1a89   :  { %2949 = vrsqrt.f32 %v2400_v42  ;;  %v2401_v4 = vadd.f32 1e-05, %v2399_v43 }
0x1a8b   :  { %2951 = vrsqrt.f32 %v2401_v4 }
0x1a93   :  { %v2950_v44 = vpop.eup %2949 }
0x1a94   :  { %v2404_v46 = vmul.f32 %v2950_v44, %v2388_v16 }
0x1a95   :  { %v2952_v48 = vpop.eup %2951 }
0x1a96   :  { %v2405_v22 = vmul.f32 %v2952_v48, %v2389_v34  ;;  %v2410_v49 = vmul.f32 %v2504_v45, %v2404_v46 }
0x1a98   :  { %v2411_v50 = vmul.f32 %v2504_v45, %v2405_v22  ;;  %v2416_v51 = vadd.f32 %v2505_v26, %v2410_v49 }
0x1a9a   :  { %v2417_v37 = vadd.f32 %v2505_v26, %v2411_v50  ;;  %2418 = vst.msk [vmem:[#allocation2] sm:$0xff] %vm65_vm1, %v2416_v51 }
0x1a9c   :  { %2419 = vst.msk [vmem:[#allocation2 + $0x8] sm:$0xff] %vm65_vm1, %v2417_v37 }
0x1a9d   :  { %2964 = shalt.err (!%p2961_p4)
}
0x1a9e   :  { %s2965_s25 = scalar_lea.hbm %s3536_s10, 256 }
0x1a9f   :  { %p2966_p5 = scmp.ne.s32.totalorder %s3536_s10, %s2965_s25  ;;  %p2969_p6 = scmp.lt.u32.totalorder %s2965_s25, %s3536_s10 }
0x1aa1   :  { %p2971_p7 = pnand %p2969_p6, %p2966_p5 }
0x1aa3   :  { %2974 = shalt.err (!%p2971_p7)
}
0x1aa4   :  { %s2989_s12 = smov 128   ;;  %s2990_s21 = smov 8  }
0x1aa5   :  { %2431 = dma.vmem_to_hbm [thread:$0]  %s2426_s0, 256, %s3536_s10, [#allocation3], %s2989_s12, %s2989_s12, %s2990_s21  }
0x1aa6   :  { %2975 = dma.done.wait [#allocation3], 256  }
0x1aa7   :  { %2976 = vsyncadd [#allocation3], 4294967040 }
0x1aa8   :  { %2435 = vsyncpa [#allocation3], 1 }

</bundles_post_ra>
